<compile_context>
chip_gen: v7x
topology: tpu7x:2x2x1
jax: 0.10.0
libtpu: 0.0.40
codegen_flags: <defaults>
</compile_context>

<pallas_src>
import math
from functools import partial

import jax
import jax.numpy as jnp
from jax.experimental import pallas as pl
from jax.experimental.pallas import tpu as pltpu

# ---------------- small synthetic BERT config ----------------
VOCAB = 100          # vocab size (synthetic, not the real 30522)
TYPE_VOCAB = 2
MAX_POS = 16
HIDDEN = 32          # bert hidden size (synthetic small)
N_HEADS = 4
HEAD_DIM = HIDDEN // N_HEADS
INTERMEDIATE = 64
N_LAYERS = 2
N_CLASSES = 17       # 17 SDG goals
LN_EPS = 1e-12

PROBS_PAD = 128      # lane-padded width for per-row attention probs (nH*S -> 128)
CLS_PAD = 128        # lane-padded classifier width (17 -> 128)
W_PACK = 3 * HIDDEN + HIDDEN + INTERMEDIATE   # packed [wq|wk|wv|wo|wi] columns

# TODO(synk): pretrained 'bert-base-uncased' weights cannot be loaded here;
# parameters are deterministic random-initialized with the same structure.

# packed per-layer bias / LN block row layout, shape (8, 128) f32:
ROW_BQKV, ROW_BO, ROW_LN1G, ROW_LN1B, ROW_BI, ROW_BO2, ROW_LN2G, ROW_LN2B = range(8)
# packed misc block row layout, shape (4, 128) f32:
ROW_EMB_LNG, ROW_EMB_LNB, ROW_POOL_B, ROW_CLS_B = range(4)


# ---------------- fused whole-model Pallas kernel ----------------
def _bert_kernel(emb_hbm, mask_ref, wpack_ref, wo2_ref, bias_ref, misc_ref,
                 poolw_ref, clsw_ref,
                 logits_ref, pooled_ref, probs_ref,
                 x_ref, dma_sem,
                 *, B, S, nH, d, i_dim, eps):
    layer = pl.program_id(0)
    H = nH * d
    M = B * S

    def mm(a, w):
        # bf16 MXU operands, f32 accumulation.
        return jnp.dot(a.astype(jnp.bfloat16), w.astype(jnp.bfloat16),
                       preferred_element_type=jnp.float32)

    def layernorm(h, g, b):
        mu = jnp.mean(h, axis=-1, keepdims=True)
        var = jnp.mean(jnp.square(h - mu), axis=-1, keepdims=True)
        return (h - mu) * jax.lax.rsqrt(var + eps) * g + b

    bias = bias_ref[0]        # (8, 128) packed per-layer biases / LN params
    misc = misc_ref[...]      # (4, 128) emb-LN / pooler / classifier vectors

    # ---- step 0: pull the embedding sum out of HBM into the resident
    # activation scratch (manual DMA -> no per-layer double-buffered (M,H)
    # block), then apply the embedding LayerNorm in place (no residual) ----
    @pl.when(layer == 0)
    def _():
        cp = pltpu.make_async_copy(emb_hbm, x_ref, dma_sem)
        cp.start()
        cp.wait()
        x_ref[...] = layernorm(x_ref[...],
                               misc[ROW_EMB_LNG:ROW_EMB_LNG + 1, :H],
                               misc[ROW_EMB_LNB:ROW_EMB_LNB + 1, :H])

    x = x_ref[...]            # (M, H) f32, resident in VMEM across layers

    # ---- per-layer packed weights: one DMA, then cheap VMEM slices ----
    w = wpack_ref[0]                          # (H, 3H + H + I) bf16
    w_qkv = w[:, :3 * H]                      # (H, 3H)  (wq pre-scaled 1/sqrt(d))
    w_o = w[:, 3 * H:4 * H]                   # (H, H)
    w_i = w[:, 4 * H:4 * H + i_dim]           # (H, I)

    # ---- fused QKV projection: one (M,H) x (H,3H) MXU pass ----
    qkv = mm(x, w_qkv) + bias[ROW_BQKV:ROW_BQKV + 1, :3 * H]     # (M, 3H)
    qkv3 = qkv.reshape(B, S, 3 * H)

    # hoisted mask broadcast (done once, not per head)
    mask_b = jnp.broadcast_to(mask_ref[...], (B, S, S))          # (B, S, S)
    zeros_pad = jnp.zeros((B, S, PROBS_PAD - nH * S), jnp.float32)

    dn_qk = (((2,), (2,)), ((0,), (0,)))   # bqd,bkd->bqk (contract d, batch B)
    dn_pv = (((2,), (1,)), ((0,), (0,)))   # bqk,bkd->bqd

    prob_heads = []
    ctx_heads = []
    for h in range(nH):       # static unroll over heads; batched over B on MXU
        qh = qkv3[:, :, h * d:(h + 1) * d]                 # (B, S, d)
        kh = qkv3[:, :, H + h * d:H + (h + 1) * d]
        vh = qkv3[:, :, 2 * H + h * d:2 * H + (h + 1) * d]
        s = jax.lax.dot_general(qh.astype(jnp.bfloat16), kh.astype(jnp.bfloat16),
                                dn_qk, preferred_element_type=jnp.float32)
        s = s + mask_b                                     # (B, S, S)
        s = s - jnp.max(s, axis=-1, keepdims=True)
        e = jnp.exp(s)
        p = e / jnp.sum(e, axis=-1, keepdims=True)         # exact softmax (parity)
        prob_heads.append(p)                               # (B, S, S)
        ctx_heads.append(jax.lax.dot_general(
            p.astype(jnp.bfloat16), vh.astype(jnp.bfloat16),
            dn_pv, preferred_element_type=jnp.float32))    # (B, S, d)

    # lane-dense attention-probs write-back: (M, 128) full-lane unmasked store,
    # cols [h*S:(h+1)*S] per head, zero-padded tail sliced off in glue.
    probs_ref[0] = jnp.concatenate(prob_heads + [zeros_pad],
                                   axis=-1).reshape(M, PROBS_PAD)
    ctx = jnp.concatenate(ctx_heads, axis=-1).reshape(M, H)      # merged heads

    # ---- attention output projection + Add&LN ----
    attn_out = mm(ctx, w_o) + bias[ROW_BO:ROW_BO + 1, :H]
    x = layernorm(attn_out + x,
                  bias[ROW_LN1G:ROW_LN1G + 1, :H],
                  bias[ROW_LN1B:ROW_LN1B + 1, :H])

    # ---- feed-forward (exact erf GELU) + Add&LN ----
    inter = mm(x, w_i) + bias[ROW_BI:ROW_BI + 1, :i_dim]
    inter = 0.5 * inter * (1.0 + jax.lax.erf(inter * (1.0 / math.sqrt(2.0))))
    ffn_out = mm(inter, wo2_ref[0]) + bias[ROW_BO2:ROW_BO2 + 1, :H]
    x = layernorm(ffn_out + x,
                  bias[ROW_LN2G:ROW_LN2G + 1, :H],
                  bias[ROW_LN2B:ROW_LN2B + 1, :H])

    x_ref[...] = x            # carry to the next layer (VMEM resident)

    # ---- pooler (tanh) + SDG head, fused into the last grid step.
    # These constant-index output blocks are written exactly once, here, and
    # written back after the final step (Pallas revisit semantics). ----
    @pl.when(layer == pl.num_programs(0) - 1)
    def _():
        # one strided sublane load of the [CLS] rows (rows 0, S, 2S, ...)
        cls_tok = x_ref[pl.ds(0, B, stride=S), :]          # (B, H)
        pooled = jnp.tanh(mm(cls_tok, poolw_ref[...]) +
                          misc[ROW_POOL_B:ROW_POOL_B + 1, :H])
        pooled_ref[...] = pooled
        # classifier padded to 128 lanes -> unmasked full-lane store; glue
        # slices [:, :N_CLASSES].
        logits_ref[...] = (mm(pooled, clsw_ref[...]) +
                           misc[ROW_CLS_B:ROW_CLS_B + 1, :])


# ---------------- parameters ----------------
def init_params(key):
    keys = iter(jax.random.split(key, 64))

    def nrm(shape):
        return 0.02 * jax.random.normal(next(keys), shape, dtype=jnp.float32)

    H, I, L, C = HIDDEN, INTERMEDIATE, N_LAYERS, N_CLASSES
    scale = 1.0 / math.sqrt(HEAD_DIM)

    w_pack, wo2, bias_rows = [], [], []
    for _ in range(L):
        wq, wk, wv = nrm((H, H)), nrm((H, H)), nrm((H, H))
        wo, wi = nrm((H, H)), nrm((H, I))
        # fold the 1/sqrt(d) attention scale into wq (its bias, zero here,
        # would be scaled identically) -> zero in-kernel scaling cost.
        wq = wq * scale
        # packed per-layer weight block: [wq|wk|wv | wo | wi] along columns
        w_pack.append(jnp.concatenate([wq, wk, wv, wo, wi], axis=1))  # (H, 192)
        wo2.append(nrm((I, H)))
        rows = jnp.zeros((8, 128), jnp.float32)                # packed biases
        rows = rows.at[ROW_LN1G, :H].set(1.0)                  # LN gammas = 1
        rows = rows.at[ROW_LN2G, :H].set(1.0)                  # (rest zero)
        bias_rows.append(rows)

    misc = jnp.zeros((4, 128), jnp.float32)
    misc = misc.at[ROW_EMB_LNG, :H].set(1.0)   # emb LN gamma; beta/biases = 0

    cls_w = nrm((H, C))
    cls_w_pad = jnp.zeros((H, CLS_PAD), jnp.float32).at[:, :C].set(cls_w)

    return {
        "word_emb": nrm((VOCAB, H)),
        "pos_emb": nrm((MAX_POS, H)),
        "type_emb": nrm((TYPE_VOCAB, H)),
        # matmul weights stored bf16 (halved DMA / VMEM, f32 MXU accumulation)
        "w_pack": jnp.stack(w_pack).astype(jnp.bfloat16),      # (L, H, 3H+H+I)
        "wo2": jnp.stack(wo2).astype(jnp.bfloat16),            # (L, I, H)
        "bias_pack": jnp.stack(bias_rows),                     # (L, 8, 128) f32
        "misc_pack": misc,                                     # (4, 128) f32
        "pool_w": nrm((H, H)).astype(jnp.bfloat16),
        "cls_w_pad": cls_w_pad.astype(jnp.bfloat16),           # (H, 128) padded
    }


# ---------------- forward pass (== BertForSDGs.forward) ----------------
def bert_for_sdgs_forward(params, ids, mask, token_type_ids):
    B, S = ids.shape
    M = B * S
    H, L, I = HIDDEN, N_LAYERS, INTERMEDIATE

    # Embedding gathers are glue, kept in plain JAX.
    emb = (params["word_emb"][ids]
           + params["pos_emb"][jnp.arange(S)][None, :, :]
           + params["type_emb"][token_type_ids]).reshape(M, H)

    # HF-style extended additive attention mask: (1 - mask) * -10000, (B, 1, S)
    add_mask = ((1.0 - mask.astype(jnp.float32)) * -10000.0).reshape(B, 1, S)

    kernel = partial(_bert_kernel, B=B, S=S, nH=N_HEADS, d=HEAD_DIM,
                     i_dim=I, eps=LN_EPS)

    logits_pad, pooled, probs = pl.pallas_call(
        kernel,
        out_shape=(
            jax.ShapeDtypeStruct((B, CLS_PAD), jnp.float32),   # logits (padded)
            jax.ShapeDtypeStruct((B, H), jnp.float32),         # pooled (vec_0)
            jax.ShapeDtypeStruct((L, M, PROBS_PAD), jnp.float32),  # attn probs
        ),
        grid_spec=pltpu.PrefetchScalarGridSpec(
            num_scalar_prefetch=0,
            grid=(L,),
            in_specs=[
                pl.BlockSpec(memory_space=pl.ANY),                        # emb (HBM)
                pl.BlockSpec((B, 1, S), lambda l: (0, 0, 0)),             # mask
                pl.BlockSpec((1, H, W_PACK), lambda l: (l, 0, 0)),        # w pack
                pl.BlockSpec((1, I, H), lambda l: (l, 0, 0)),             # wo2
                pl.BlockSpec((1, 8, 128), lambda l: (l, 0, 0)),           # bias pack
                pl.BlockSpec((4, 128), lambda l: (0, 0)),                 # misc pack
                pl.BlockSpec((H, H), lambda l: (0, 0)),                   # pool_w
                pl.BlockSpec((H, CLS_PAD), lambda l: (0, 0)),             # cls_w (pad)
            ],
            out_specs=(
                pl.BlockSpec((B, CLS_PAD), lambda l: (0, 0)),
                pl.BlockSpec((B, H), lambda l: (0, 0)),
                pl.BlockSpec((1, M, PROBS_PAD), lambda l: (l, 0, 0)),
            ),
            scratch_shapes=[
                pltpu.VMEM((M, H), jnp.float32),    # resident activation x
                pltpu.SemaphoreType.DMA,            # emb HBM->VMEM copy (step 0)
            ],
        ),
        compiler_params=pltpu.CompilerParams(
            dimension_semantics=("arbitrary",),     # layers are sequential
            vmem_limit_bytes=32 * 1024 * 1024),
    )(emb, add_mask, params["w_pack"], params["wo2"],
      params["bias_pack"], params["misc_pack"], params["pool_w"],
      params["cls_w_pad"])

    logits = logits_pad[:, :N_CLASSES]
    # glue: lane-dense (L, B*S, 128)[..., :nH*S] -> HF layout (B, nH, S, S)
    attn = (probs[:, :, :N_HEADS * S]
            .reshape(L, B, S, N_HEADS, S)
            .transpose(0, 1, 3, 2, 4))
    return logits, pooled, tuple(attn[l] for l in range(L))


if __name__ == "__main__":
    key = jax.random.PRNGKey(0)
    pkey, ikey = jax.random.split(key)
    params = init_params(pkey)

    B, S = 2, 8
    ids = jax.random.randint(ikey, (B, S), 0, VOCAB, dtype=jnp.int32)
    mask = jnp.ones((B, S), jnp.int32).at[1, 6:].set(0)       # batch 1 has padding
    token_type_ids = jnp.zeros((B, S), jnp.int32).at[:, 4:].set(1)

    fwd = jax.jit(bert_for_sdgs_forward)
    logits, pooled, attentions = fwd(params, ids, mask, token_type_ids)
    jax.block_until_ready((logits, pooled, attentions))

    assert logits.shape == (B, N_CLASSES)
    assert pooled.shape == (B, HIDDEN)
    assert len(attentions) == N_LAYERS
    assert attentions[0].shape == (B, N_HEADS, S, S)
    assert bool(jnp.all(jnp.isfinite(logits)))
    assert bool(jnp.all(jnp.isfinite(pooled)))
    # exact softmax normalization -> rows of attention probs sum to ~1
    assert bool(jnp.allclose(jnp.sum(attentions[0], axis=-1), 1.0, atol=1e-3))
    assert bool(jnp.allclose(jnp.sum(attentions[1], axis=-1), 1.0, atol=1e-3))

    print("KERNEL_OK")
</pallas_src>

<mosaic_0001>
module attributes {stable_mosaic.version = 11 : i64} {
  func.func @_bert_kernel(%arg0: i32, %arg1: memref<16x32xf32, #tpu.memory_space<any>>, %arg2: memref<2x1x8xf32, #tpu.memory_space<vmem>>, %arg3: memref<1x32x192xbf16, #tpu.memory_space<vmem>>, %arg4: memref<1x64x32xbf16, #tpu.memory_space<vmem>>, %arg5: memref<1x8x128xf32, #tpu.memory_space<vmem>>, %arg6: memref<4x128xf32, #tpu.memory_space<vmem>>, %arg7: memref<32x32xbf16, #tpu.memory_space<vmem>>, %arg8: memref<32x128xbf16, #tpu.memory_space<vmem>>, %arg9: memref<2x128xf32, #tpu.memory_space<vmem>>, %arg10: memref<2x32xf32, #tpu.memory_space<vmem>>, %arg11: memref<1x16x128xf32, #tpu.memory_space<vmem>>, %arg12: memref<16x32xf32, #tpu.memory_space<vmem>>, %arg13: memref<!tpu.dma_semaphore, #tpu.memory_space<semaphore_mem>>) attributes {dimension_semantics = [#tpu.dimension_semantics<arbitrary>], iteration_bounds = array<i64: 2>, scalar_prefetch = 0 : i64, scratch_operands = 2 : i64, tpu.core_type = #tpu.core_type<tc>, window_params = [{}, {pipeline_mode = #tpu.pipeline_mode<synchronous>, transform_indices = @transform_1, window_bounds = array<i64: 2, 1, 8>}, {transform_indices = @transform_2, window_bounds = array<i64: 1, 32, 192>}, {transform_indices = @transform_3, window_bounds = array<i64: 1, 64, 32>}, {transform_indices = @transform_4, window_bounds = array<i64: 1, 8, 128>}, {pipeline_mode = #tpu.pipeline_mode<synchronous>, transform_indices = @transform_5, window_bounds = array<i64: 4, 128>}, {pipeline_mode = #tpu.pipeline_mode<synchronous>, transform_indices = @transform_6, window_bounds = array<i64: 32, 32>}, {pipeline_mode = #tpu.pipeline_mode<synchronous>, transform_indices = @transform_7, window_bounds = array<i64: 32, 128>}, {pipeline_mode = #tpu.pipeline_mode<synchronous>, transform_indices = @transform_8, window_bounds = array<i64: 2, 128>}, {pipeline_mode = #tpu.pipeline_mode<synchronous>, transform_indices = @transform_9, window_bounds = array<i64: 2, 32>}, {transform_indices = @transform_10, window_bounds = array<i64: 1, 16, 128>}]} {
    %c0 = arith.constant 0 : index
    %c0_0 = arith.constant 0 : index
    %c0_1 = arith.constant 0 : index
    %0 = vector.load %arg5[%c0, %c0_0, %c0_1] : memref<1x8x128xf32, #tpu.memory_space<vmem>>, vector<1x8x128xf32>
    %1 = vector.shape_cast %0 : vector<1x8x128xf32> to vector<8x128xf32>
    %c0_2 = arith.constant 0 : index
    %c0_3 = arith.constant 0 : index
    %2 = vector.load %arg6[%c0_2, %c0_3] : memref<4x128xf32, #tpu.memory_space<vmem>>, vector<4x128xf32>
    %c0_i32 = arith.constant 0 : i32
    %3 = arith.cmpi eq, %arg0, %c0_i32 : i32
    %4 = arith.extui %3 : i1 to i32
    %c0_i32_4 = arith.constant 0 : i32
    %5 = arith.cmpi ne, %4, %c0_i32_4 : i32
    scf.if %5 {
      tpu.enqueue_dma source(%arg1 : memref<16x32xf32, #tpu.memory_space<any>>) target(%arg12 : memref<16x32xf32, #tpu.memory_space<vmem>>) target_semaphore(%arg13 : memref<!tpu.dma_semaphore, #tpu.memory_space<semaphore_mem>>)
      tpu.wait_dma2 semaphore(%arg13 : memref<!tpu.dma_semaphore, #tpu.memory_space<semaphore_mem>>) src(%arg1 : memref<16x32xf32, #tpu.memory_space<any>>) dst(%arg12 : memref<16x32xf32, #tpu.memory_space<vmem>>)
      %c0_55 = arith.constant 0 : index
      %c0_56 = arith.constant 0 : index
      %184 = vector.load %arg12[%c0_55, %c0_56] : memref<16x32xf32, #tpu.memory_space<vmem>>, vector<16x32xf32>
      %185 = vector.extract_strided_slice %2 {offsets = [0, 0], sizes = [1, 32], strides = [1, 1]} : vector<4x128xf32> to vector<1x32xf32>
      %186 = vector.extract_strided_slice %2 {offsets = [1, 0], sizes = [1, 32], strides = [1, 1]} : vector<4x128xf32> to vector<1x32xf32>
      %cst_57 = arith.constant dense<0.000000e+00> : vector<16xf32>
      %187 = vector.multi_reduction <add>, %184, %cst_57 [1] : vector<16x32xf32> to vector<16xf32>
      %188 = vector.shape_cast %187 : vector<16xf32> to vector<16x1xf32>
      %cst_58 = arith.constant 3.200000e+01 : f32
      %189 = vector.broadcast %cst_58 : f32 to vector<16x1xf32>
      %190 = arith.divf %188, %189 : vector<16x1xf32>
      %191 = vector.broadcast %190 : vector<16x1xf32> to vector<16x32xf32>
      %192 = arith.subf %184, %191 : vector<16x32xf32>
      %193 = arith.mulf %192, %192 : vector<16x32xf32>
      %cst_59 = arith.constant dense<0.000000e+00> : vector<16xf32>
      %194 = vector.multi_reduction <add>, %193, %cst_59 [1] : vector<16x32xf32> to vector<16xf32>
      %195 = vector.shape_cast %194 : vector<16xf32> to vector<16x1xf32>
      %cst_60 = arith.constant 3.200000e+01 : f32
      %196 = vector.broadcast %cst_60 : f32 to vector<16x1xf32>
      %197 = arith.divf %195, %196 : vector<16x1xf32>
      %198 = vector.broadcast %190 : vector<16x1xf32> to vector<16x32xf32>
      %199 = arith.subf %184, %198 : vector<16x32xf32>
      %cst_61 = arith.constant 9.99999996E-13 : f32
      %200 = vector.broadcast %cst_61 : f32 to vector<16x1xf32>
      %201 = arith.addf %197, %200 : vector<16x1xf32>
      %202 = math.rsqrt %201 : vector<16x1xf32>
      %203 = vector.broadcast %202 : vector<16x1xf32> to vector<16x32xf32>
      %204 = arith.mulf %199, %203 : vector<16x32xf32>
      %205 = vector.broadcast %185 : vector<1x32xf32> to vector<16x32xf32>
      %206 = arith.mulf %204, %205 : vector<16x32xf32>
      %207 = vector.broadcast %186 : vector<1x32xf32> to vector<16x32xf32>
      %208 = arith.addf %206, %207 : vector<16x32xf32>
      %c0_62 = arith.constant 0 : index
      %c0_63 = arith.constant 0 : index
      %209 = vector.load %arg12[%c0_62, %c0_63] : memref<16x32xf32, #tpu.memory_space<vmem>>, vector<16x32xf32>
      tpu.vector_store %arg12[%c0_62, %c0_63], %208 {strides = array<i32>} : memref<16x32xf32, #tpu.memory_space<vmem>>, vector<16x32xf32>,
    } else {
    }
    %c0_5 = arith.constant 0 : index
    %c0_6 = arith.constant 0 : index
    %6 = vector.load %arg12[%c0_5, %c0_6] : memref<16x32xf32, #tpu.memory_space<vmem>>, vector<16x32xf32>
    %c0_7 = arith.constant 0 : index
    %c0_8 = arith.constant 0 : index
    %c0_9 = arith.constant 0 : index
    %7 = vector.load %arg3[%c0_7, %c0_8, %c0_9] : memref<1x32x192xbf16, #tpu.memory_space<vmem>>, vector<1x32x192xbf16>
    %8 = vector.shape_cast %7 : vector<1x32x192xbf16> to vector<32x192xbf16>
    %9 = vector.extract_strided_slice %8 {offsets = [0, 0], sizes = [32, 96], strides = [1, 1]} : vector<32x192xbf16> to vector<32x96xbf16>
    %10 = vector.extract_strided_slice %8 {offsets = [0, 96], sizes = [32, 32], strides = [1, 1]} : vector<32x192xbf16> to vector<32x32xbf16>
    %11 = vector.extract_strided_slice %8 {offsets = [0, 128], sizes = [32, 64], strides = [1, 1]} : vector<32x192xbf16> to vector<32x64xbf16>
    %12 = arith.truncf %6 : vector<16x32xf32> to vector<16x32xbf16>
    %cst = arith.constant dense<0.000000e+00> : vector<16x96xf32>
    %13 = tpu.matmul %12, %9, %cst {dimension_numbers = #tpu.dot_dimension_numbers<[1], [0], [0], [1], [0, 0, 1, 1], [], []>} : vector<16x32xbf16>, vector<32x96xbf16>, vector<16x96xf32> -> vector<16x96xf32>
    %14 = vector.extract_strided_slice %1 {offsets = [0, 0], sizes = [1, 96], strides = [1, 1]} : vector<8x128xf32> to vector<1x96xf32>
    %15 = vector.broadcast %14 : vector<1x96xf32> to vector<16x96xf32>
    %16 = arith.addf %13, %15 : vector<16x96xf32>
    %17 = vector.shape_cast %16 : vector<16x96xf32> to vector<2x8x96xf32>
    %c0_10 = arith.constant 0 : index
    %c0_11 = arith.constant 0 : index
    %c0_12 = arith.constant 0 : index
    %18 = vector.load %arg2[%c0_10, %c0_11, %c0_12] : memref<2x1x8xf32, #tpu.memory_space<vmem>>, vector<2x1x8xf32>
    %19 = vector.shape_cast %18 : vector<2x1x8xf32> to vector<2x1x8xf32>
    %20 = vector.broadcast %19 : vector<2x1x8xf32> to vector<2x8x8xf32>
    %cst_13 = arith.constant 0.000000e+00 : f32
    %21 = vector.broadcast %cst_13 : f32 to vector<2x8x96xf32>
    %22 = vector.extract_strided_slice %17 {offsets = [0, 0, 0], sizes = [2, 8, 8], strides = [1, 1, 1]} : vector<2x8x96xf32> to vector<2x8x8xf32>
    %23 = vector.extract_strided_slice %17 {offsets = [0, 0, 32], sizes = [2, 8, 8], strides = [1, 1, 1]} : vector<2x8x96xf32> to vector<2x8x8xf32>
    %24 = vector.extract_strided_slice %17 {offsets = [0, 0, 64], sizes = [2, 8, 8], strides = [1, 1, 1]} : vector<2x8x96xf32> to vector<2x8x8xf32>
    %25 = arith.truncf %22 : vector<2x8x8xf32> to vector<2x8x8xbf16>
    %26 = arith.truncf %23 : vector<2x8x8xf32> to vector<2x8x8xbf16>
    %cst_14 = arith.constant dense<0.000000e+00> : vector<2x8x8xf32>
    %27 = tpu.matmul %25, %26, %cst_14 {dimension_numbers = #tpu.dot_dimension_numbers<[2], [2], [1], [1], [0, 0, 0, 1, 1, 1], [0], [0]>} : vector<2x8x8xbf16>, vector<2x8x8xbf16>, vector<2x8x8xf32> -> vector<2x8x8xf32>
    %28 = arith.addf %27, %20 : vector<2x8x8xf32>
    %cst_15 = arith.constant dense<0xFF800000> : vector<2x8xf32>
    %29 = vector.multi_reduction <maximumf>, %28, %cst_15 [2] : vector<2x8x8xf32> to vector<2x8xf32>
    %30 = vector.shape_cast %29 : vector<2x8xf32> to vector<2x8x1xf32>
    %31 = vector.broadcast %30 : vector<2x8x1xf32> to vector<2x8x8xf32>
    %32 = arith.subf %28, %31 : vector<2x8x8xf32>
    %33 = math.exp %32 : vector<2x8x8xf32>
    %cst_16 = arith.constant dense<0.000000e+00> : vector<2x8xf32>
    %34 = vector.multi_reduction <add>, %33, %cst_16 [2] : vector<2x8x8xf32> to vector<2x8xf32>
    %35 = vector.shape_cast %34 : vector<2x8xf32> to vector<2x8x1xf32>
    %36 = vector.broadcast %35 : vector<2x8x1xf32> to vector<2x8x8xf32>
    %37 = arith.divf %33, %36 : vector<2x8x8xf32>
    %38 = arith.truncf %37 : vector<2x8x8xf32> to vector<2x8x8xbf16>
    %39 = arith.truncf %24 : vector<2x8x8xf32> to vector<2x8x8xbf16>
    %cst_17 = arith.constant dense<0.000000e+00> : vector<2x8x8xf32>
    %40 = tpu.matmul %38, %39, %cst_17 {dimension_numbers = #tpu.dot_dimension_numbers<[2], [1], [1], [2], [0, 0, 0, 1, 1, 2], [0], [0]>} : vector<2x8x8xbf16>, vector<2x8x8xbf16>, vector<2x8x8xf32> -> vector<2x8x8xf32>
    %41 = vector.extract_strided_slice %17 {offsets = [0, 0, 8], sizes = [2, 8, 8], strides = [1, 1, 1]} : vector<2x8x96xf32> to vector<2x8x8xf32>
    %42 = vector.extract_strided_slice %17 {offsets = [0, 0, 40], sizes = [2, 8, 8], strides = [1, 1, 1]} : vector<2x8x96xf32> to vector<2x8x8xf32>
    %43 = vector.extract_strided_slice %17 {offsets = [0, 0, 72], sizes = [2, 8, 8], strides = [1, 1, 1]} : vector<2x8x96xf32> to vector<2x8x8xf32>
    %44 = arith.truncf %41 : vector<2x8x8xf32> to vector<2x8x8xbf16>
    %45 = arith.truncf %42 : vector<2x8x8xf32> to vector<2x8x8xbf16>
    %cst_18 = arith.constant dense<0.000000e+00> : vector<2x8x8xf32>
    %46 = tpu.matmul %44, %45, %cst_18 {dimension_numbers = #tpu.dot_dimension_numbers<[2], [2], [1], [1], [0, 0, 0, 1, 1, 1], [0], [0]>} : vector<2x8x8xbf16>, vector<2x8x8xbf16>, vector<2x8x8xf32> -> vector<2x8x8xf32>
    %47 = arith.addf %46, %20 : vector<2x8x8xf32>
    %cst_19 = arith.constant dense<0xFF800000> : vector<2x8xf32>
    %48 = vector.multi_reduction <maximumf>, %47, %cst_19 [2] : vector<2x8x8xf32> to vector<2x8xf32>
    %49 = vector.shape_cast %48 : vector<2x8xf32> to vector<2x8x1xf32>
    %50 = vector.broadcast %49 : vector<2x8x1xf32> to vector<2x8x8xf32>
    %51 = arith.subf %47, %50 : vector<2x8x8xf32>
    %52 = math.exp %51 : vector<2x8x8xf32>
    %cst_20 = arith.constant dense<0.000000e+00> : vector<2x8xf32>
    %53 = vector.multi_reduction <add>, %52, %cst_20 [2] : vector<2x8x8xf32> to vector<2x8xf32>
    %54 = vector.shape_cast %53 : vector<2x8xf32> to vector<2x8x1xf32>
    %55 = vector.broadcast %54 : vector<2x8x1xf32> to vector<2x8x8xf32>
    %56 = arith.divf %52, %55 : vector<2x8x8xf32>
    %57 = arith.truncf %56 : vector<2x8x8xf32> to vector<2x8x8xbf16>
    %58 = arith.truncf %43 : vector<2x8x8xf32> to vector<2x8x8xbf16>
    %cst_21 = arith.constant dense<0.000000e+00> : vector<2x8x8xf32>
    %59 = tpu.matmul %57, %58, %cst_21 {dimension_numbers = #tpu.dot_dimension_numbers<[2], [1], [1], [2], [0, 0, 0, 1, 1, 2], [0], [0]>} : vector<2x8x8xbf16>, vector<2x8x8xbf16>, vector<2x8x8xf32> -> vector<2x8x8xf32>
    %60 = vector.extract_strided_slice %17 {offsets = [0, 0, 16], sizes = [2, 8, 8], strides = [1, 1, 1]} : vector<2x8x96xf32> to vector<2x8x8xf32>
    %61 = vector.extract_strided_slice %17 {offsets = [0, 0, 48], sizes = [2, 8, 8], strides = [1, 1, 1]} : vector<2x8x96xf32> to vector<2x8x8xf32>
    %62 = vector.extract_strided_slice %17 {offsets = [0, 0, 80], sizes = [2, 8, 8], strides = [1, 1, 1]} : vector<2x8x96xf32> to vector<2x8x8xf32>
    %63 = arith.truncf %60 : vector<2x8x8xf32> to vector<2x8x8xbf16>
    %64 = arith.truncf %61 : vector<2x8x8xf32> to vector<2x8x8xbf16>
    %cst_22 = arith.constant dense<0.000000e+00> : vector<2x8x8xf32>
    %65 = tpu.matmul %63, %64, %cst_22 {dimension_numbers = #tpu.dot_dimension_numbers<[2], [2], [1], [1], [0, 0, 0, 1, 1, 1], [0], [0]>} : vector<2x8x8xbf16>, vector<2x8x8xbf16>, vector<2x8x8xf32> -> vector<2x8x8xf32>
    %66 = arith.addf %65, %20 : vector<2x8x8xf32>
    %cst_23 = arith.constant dense<0xFF800000> : vector<2x8xf32>
    %67 = vector.multi_reduction <maximumf>, %66, %cst_23 [2] : vector<2x8x8xf32> to vector<2x8xf32>
    %68 = vector.shape_cast %67 : vector<2x8xf32> to vector<2x8x1xf32>
    %69 = vector.broadcast %68 : vector<2x8x1xf32> to vector<2x8x8xf32>
    %70 = arith.subf %66, %69 : vector<2x8x8xf32>
    %71 = math.exp %70 : vector<2x8x8xf32>
    %cst_24 = arith.constant dense<0.000000e+00> : vector<2x8xf32>
    %72 = vector.multi_reduction <add>, %71, %cst_24 [2] : vector<2x8x8xf32> to vector<2x8xf32>
    %73 = vector.shape_cast %72 : vector<2x8xf32> to vector<2x8x1xf32>
    %74 = vector.broadcast %73 : vector<2x8x1xf32> to vector<2x8x8xf32>
    %75 = arith.divf %71, %74 : vector<2x8x8xf32>
    %76 = arith.truncf %75 : vector<2x8x8xf32> to vector<2x8x8xbf16>
    %77 = arith.truncf %62 : vector<2x8x8xf32> to vector<2x8x8xbf16>
    %cst_25 = arith.constant dense<0.000000e+00> : vector<2x8x8xf32>
    %78 = tpu.matmul %76, %77, %cst_25 {dimension_numbers = #tpu.dot_dimension_numbers<[2], [1], [1], [2], [0, 0, 0, 1, 1, 2], [0], [0]>} : vector<2x8x8xbf16>, vector<2x8x8xbf16>, vector<2x8x8xf32> -> vector<2x8x8xf32>
    %79 = vector.extract_strided_slice %17 {offsets = [0, 0, 24], sizes = [2, 8, 8], strides = [1, 1, 1]} : vector<2x8x96xf32> to vector<2x8x8xf32>
    %80 = vector.extract_strided_slice %17 {offsets = [0, 0, 56], sizes = [2, 8, 8], strides = [1, 1, 1]} : vector<2x8x96xf32> to vector<2x8x8xf32>
    %81 = vector.extract_strided_slice %17 {offsets = [0, 0, 88], sizes = [2, 8, 8], strides = [1, 1, 1]} : vector<2x8x96xf32> to vector<2x8x8xf32>
    %82 = arith.truncf %79 : vector<2x8x8xf32> to vector<2x8x8xbf16>
    %83 = arith.truncf %80 : vector<2x8x8xf32> to vector<2x8x8xbf16>
    %cst_26 = arith.constant dense<0.000000e+00> : vector<2x8x8xf32>
    %84 = tpu.matmul %82, %83, %cst_26 {dimension_numbers = #tpu.dot_dimension_numbers<[2], [2], [1], [1], [0, 0, 0, 1, 1, 1], [0], [0]>} : vector<2x8x8xbf16>, vector<2x8x8xbf16>, vector<2x8x8xf32> -> vector<2x8x8xf32>
    %85 = arith.addf %84, %20 : vector<2x8x8xf32>
    %cst_27 = arith.constant dense<0xFF800000> : vector<2x8xf32>
    %86 = vector.multi_reduction <maximumf>, %85, %cst_27 [2] : vector<2x8x8xf32> to vector<2x8xf32>
    %87 = vector.shape_cast %86 : vector<2x8xf32> to vector<2x8x1xf32>
    %88 = vector.broadcast %87 : vector<2x8x1xf32> to vector<2x8x8xf32>
    %89 = arith.subf %85, %88 : vector<2x8x8xf32>
    %90 = math.exp %89 : vector<2x8x8xf32>
    %cst_28 = arith.constant dense<0.000000e+00> : vector<2x8xf32>
    %91 = vector.multi_reduction <add>, %90, %cst_28 [2] : vector<2x8x8xf32> to vector<2x8xf32>
    %92 = vector.shape_cast %91 : vector<2x8xf32> to vector<2x8x1xf32>
    %93 = vector.broadcast %92 : vector<2x8x1xf32> to vector<2x8x8xf32>
    %94 = arith.divf %90, %93 : vector<2x8x8xf32>
    %95 = arith.truncf %94 : vector<2x8x8xf32> to vector<2x8x8xbf16>
    %96 = arith.truncf %81 : vector<2x8x8xf32> to vector<2x8x8xbf16>
    %cst_29 = arith.constant dense<0.000000e+00> : vector<2x8x8xf32>
    %97 = tpu.matmul %95, %96, %cst_29 {dimension_numbers = #tpu.dot_dimension_numbers<[2], [1], [1], [2], [0, 0, 0, 1, 1, 2], [0], [0]>} : vector<2x8x8xbf16>, vector<2x8x8xbf16>, vector<2x8x8xf32> -> vector<2x8x8xf32>
    %98 = tpu.concatenate %37, %56, %75, %94, %21 in 2 : vector<2x8x8xf32>, vector<2x8x8xf32>, vector<2x8x8xf32>, vector<2x8x8xf32>, vector<2x8x96xf32> -> vector<2x8x128xf32>
    %99 = vector.shape_cast %98 : vector<2x8x128xf32> to vector<16x128xf32>
    %c0_30 = arith.constant 0 : index
    %c0_31 = arith.constant 0 : index
    %c0_32 = arith.constant 0 : index
    %100 = vector.load %arg11[%c0_30, %c0_31, %c0_32] : memref<1x16x128xf32, #tpu.memory_space<vmem>>, vector<1x16x128xf32>
    %101 = vector.shape_cast %100 : vector<1x16x128xf32> to vector<16x128xf32>
    %102 = vector.shape_cast %99 : vector<16x128xf32> to vector<1x16x128xf32>
    tpu.vector_store %arg11[%c0_30, %c0_31, %c0_32], %102 {strides = array<i32>} : memref<1x16x128xf32, #tpu.memory_space<vmem>>, vector<1x16x128xf32>,
    %103 = tpu.concatenate %40, %59, %78, %97 in 2 : vector<2x8x8xf32>, vector<2x8x8xf32>, vector<2x8x8xf32>, vector<2x8x8xf32> -> vector<2x8x32xf32>
    %104 = vector.shape_cast %103 : vector<2x8x32xf32> to vector<16x32xf32>
    %105 = arith.truncf %104 : vector<16x32xf32> to vector<16x32xbf16>
    %cst_33 = arith.constant dense<0.000000e+00> : vector<16x32xf32>
    %106 = tpu.matmul %105, %10, %cst_33 {dimension_numbers = #tpu.dot_dimension_numbers<[1], [0], [0], [1], [0, 0, 1, 1], [], []>} : vector<16x32xbf16>, vector<32x32xbf16>, vector<16x32xf32> -> vector<16x32xf32>
    %107 = vector.extract_strided_slice %1 {offsets = [1, 0], sizes = [1, 32], strides = [1, 1]} : vector<8x128xf32> to vector<1x32xf32>
    %108 = vector.broadcast %107 : vector<1x32xf32> to vector<16x32xf32>
    %109 = arith.addf %106, %108 : vector<16x32xf32>
    %110 = arith.addf %109, %6 : vector<16x32xf32>
    %111 = vector.extract_strided_slice %1 {offsets = [2, 0], sizes = [1, 32], strides = [1, 1]} : vector<8x128xf32> to vector<1x32xf32>
    %112 = vector.extract_strided_slice %1 {offsets = [3, 0], sizes = [1, 32], strides = [1, 1]} : vector<8x128xf32> to vector<1x32xf32>
    %cst_34 = arith.constant dense<0.000000e+00> : vector<16xf32>
    %113 = vector.multi_reduction <add>, %110, %cst_34 [1] : vector<16x32xf32> to vector<16xf32>
    %114 = vector.shape_cast %113 : vector<16xf32> to vector<16x1xf32>
    %cst_35 = arith.constant 3.200000e+01 : f32
    %115 = vector.broadcast %cst_35 : f32 to vector<16x1xf32>
    %116 = arith.divf %114, %115 : vector<16x1xf32>
    %117 = vector.broadcast %116 : vector<16x1xf32> to vector<16x32xf32>
    %118 = arith.subf %110, %117 : vector<16x32xf32>
    %119 = arith.mulf %118, %118 : vector<16x32xf32>
    %cst_36 = arith.constant dense<0.000000e+00> : vector<16xf32>
    %120 = vector.multi_reduction <add>, %119, %cst_36 [1] : vector<16x32xf32> to vector<16xf32>
    %121 = vector.shape_cast %120 : vector<16xf32> to vector<16x1xf32>
    %cst_37 = arith.constant 3.200000e+01 : f32
    %122 = vector.broadcast %cst_37 : f32 to vector<16x1xf32>
    %123 = arith.divf %121, %122 : vector<16x1xf32>
    %124 = vector.broadcast %116 : vector<16x1xf32> to vector<16x32xf32>
    %125 = arith.subf %110, %124 : vector<16x32xf32>
    %cst_38 = arith.constant 9.99999996E-13 : f32
    %126 = vector.broadcast %cst_38 : f32 to vector<16x1xf32>
    %127 = arith.addf %123, %126 : vector<16x1xf32>
    %128 = math.rsqrt %127 : vector<16x1xf32>
    %129 = vector.broadcast %128 : vector<16x1xf32> to vector<16x32xf32>
    %130 = arith.mulf %125, %129 : vector<16x32xf32>
    %131 = vector.broadcast %111 : vector<1x32xf32> to vector<16x32xf32>
    %132 = arith.mulf %130, %131 : vector<16x32xf32>
    %133 = vector.broadcast %112 : vector<1x32xf32> to vector<16x32xf32>
    %134 = arith.addf %132, %133 : vector<16x32xf32>
    %135 = arith.truncf %134 : vector<16x32xf32> to vector<16x32xbf16>
    %cst_39 = arith.constant dense<0.000000e+00> : vector<16x64xf32>
    %136 = tpu.matmul %135, %11, %cst_39 {dimension_numbers = #tpu.dot_dimension_numbers<[1], [0], [0], [1], [0, 0, 1, 1], [], []>} : vector<16x32xbf16>, vector<32x64xbf16>, vector<16x64xf32> -> vector<16x64xf32>
    %137 = vector.extract_strided_slice %1 {offsets = [4, 0], sizes = [1, 64], strides = [1, 1]} : vector<8x128xf32> to vector<1x64xf32>
    %138 = vector.broadcast %137 : vector<1x64xf32> to vector<16x64xf32>
    %139 = arith.addf %136, %138 : vector<16x64xf32>
    %cst_40 = arith.constant 5.000000e-01 : f32
    %140 = vector.broadcast %cst_40 : f32 to vector<16x64xf32>
    %141 = arith.mulf %140, %139 : vector<16x64xf32>
    %cst_41 = arith.constant 0.707106769 : f32
    %142 = vector.broadcast %cst_41 : f32 to vector<16x64xf32>
    %143 = arith.mulf %139, %142 : vector<16x64xf32>
    %144 = math.erf %143 : vector<16x64xf32>
    %cst_42 = arith.constant 1.000000e+00 : f32
    %145 = vector.broadcast %cst_42 : f32 to vector<16x64xf32>
    %146 = arith.addf %145, %144 : vector<16x64xf32>
    %147 = arith.mulf %141, %146 : vector<16x64xf32>
    %c0_43 = arith.constant 0 : index
    %c0_44 = arith.constant 0 : index
    %c0_45 = arith.constant 0 : index
    %148 = vector.load %arg4[%c0_43, %c0_44, %c0_45] : memref<1x64x32xbf16, #tpu.memory_space<vmem>>, vector<1x64x32xbf16>
    %149 = vector.shape_cast %148 : vector<1x64x32xbf16> to vector<64x32xbf16>
    %150 = arith.truncf %147 : vector<16x64xf32> to vector<16x64xbf16>
    %cst_46 = arith.constant dense<0.000000e+00> : vector<16x32xf32>
    %151 = tpu.matmul %150, %149, %cst_46 {dimension_numbers = #tpu.dot_dimension_numbers<[1], [0], [0], [1], [0, 0, 1, 1], [], []>} : vector<16x64xbf16>, vector<64x32xbf16>, vector<16x32xf32> -> vector<16x32xf32>
    %152 = vector.extract_strided_slice %1 {offsets = [5, 0], sizes = [1, 32], strides = [1, 1]} : vector<8x128xf32> to vector<1x32xf32>
    %153 = vector.broadcast %152 : vector<1x32xf32> to vector<16x32xf32>
    %154 = arith.addf %151, %153 : vector<16x32xf32>
    %155 = arith.addf %154, %134 : vector<16x32xf32>
    %156 = vector.extract_strided_slice %1 {offsets = [6, 0], sizes = [1, 32], strides = [1, 1]} : vector<8x128xf32> to vector<1x32xf32>
    %157 = vector.extract_strided_slice %1 {offsets = [7, 0], sizes = [1, 32], strides = [1, 1]} : vector<8x128xf32> to vector<1x32xf32>
    %cst_47 = arith.constant dense<0.000000e+00> : vector<16xf32>
    %158 = vector.multi_reduction <add>, %155, %cst_47 [1] : vector<16x32xf32> to vector<16xf32>
    %159 = vector.shape_cast %158 : vector<16xf32> to vector<16x1xf32>
    %cst_48 = arith.constant 3.200000e+01 : f32
    %160 = vector.broadcast %cst_48 : f32 to vector<16x1xf32>
    %161 = arith.divf %159, %160 : vector<16x1xf32>
    %162 = vector.broadcast %161 : vector<16x1xf32> to vector<16x32xf32>
    %163 = arith.subf %155, %162 : vector<16x32xf32>
    %164 = arith.mulf %163, %163 : vector<16x32xf32>
    %cst_49 = arith.constant dense<0.000000e+00> : vector<16xf32>
    %165 = vector.multi_reduction <add>, %164, %cst_49 [1] : vector<16x32xf32> to vector<16xf32>
    %166 = vector.shape_cast %165 : vector<16xf32> to vector<16x1xf32>
    %cst_50 = arith.constant 3.200000e+01 : f32
    %167 = vector.broadcast %cst_50 : f32 to vector<16x1xf32>
    %168 = arith.divf %166, %167 : vector<16x1xf32>
    %169 = vector.broadcast %161 : vector<16x1xf32> to vector<16x32xf32>
    %170 = arith.subf %155, %169 : vector<16x32xf32>
    %cst_51 = arith.constant 9.99999996E-13 : f32
    %171 = vector.broadcast %cst_51 : f32 to vector<16x1xf32>
    %172 = arith.addf %168, %171 : vector<16x1xf32>
    %173 = math.rsqrt %172 : vector<16x1xf32>
    %174 = vector.broadcast %173 : vector<16x1xf32> to vector<16x32xf32>
    %175 = arith.mulf %170, %174 : vector<16x32xf32>
    %176 = vector.broadcast %156 : vector<1x32xf32> to vector<16x32xf32>
    %177 = arith.mulf %175, %176 : vector<16x32xf32>
    %178 = vector.broadcast %157 : vector<1x32xf32> to vector<16x32xf32>
    %179 = arith.addf %177, %178 : vector<16x32xf32>
    %c0_52 = arith.constant 0 : index
    %c0_53 = arith.constant 0 : index
    %180 = vector.load %arg12[%c0_52, %c0_53] : memref<16x32xf32, #tpu.memory_space<vmem>>, vector<16x32xf32>
    tpu.vector_store %arg12[%c0_52, %c0_53], %179 {strides = array<i32>} : memref<16x32xf32, #tpu.memory_space<vmem>>, vector<16x32xf32>,
    %c1_i32 = arith.constant 1 : i32
    %181 = arith.cmpi eq, %arg0, %c1_i32 : i32
    %182 = arith.extui %181 : i1 to i32
    %c0_i32_54 = arith.constant 0 : i32
    %183 = arith.cmpi ne, %182, %c0_i32_54 : i32
    scf.if %183 {
      %c0_55 = arith.constant 0 : index
      %c0_56 = arith.constant 0 : index
      %184 = tpu.strided_load %arg12[%c0_55, %c0_56] {strides = array<i32: 8, 1>} : memref<16x32xf32, #tpu.memory_space<vmem>>, vector<2x32xf32>
      %c0_57 = arith.constant 0 : index
      %c0_58 = arith.constant 0 : index
      %185 = vector.load %arg7[%c0_57, %c0_58] : memref<32x32xbf16, #tpu.memory_space<vmem>>, vector<32x32xbf16>
      %186 = arith.truncf %184 : vector<2x32xf32> to vector<2x32xbf16>
      %cst_59 = arith.constant dense<0.000000e+00> : vector<2x32xf32>
      %187 = tpu.matmul %186, %185, %cst_59 {dimension_numbers = #tpu.dot_dimension_numbers<[1], [0], [0], [1], [0, 0, 1, 1], [], []>} : vector<2x32xbf16>, vector<32x32xbf16>, vector<2x32xf32> -> vector<2x32xf32>
      %188 = vector.extract_strided_slice %2 {offsets = [2, 0], sizes = [1, 32], strides = [1, 1]} : vector<4x128xf32> to vector<1x32xf32>
      %189 = vector.broadcast %188 : vector<1x32xf32> to vector<2x32xf32>
      %190 = arith.addf %187, %189 : vector<2x32xf32>
      %191 = math.tanh %190 : vector<2x32xf32>
      %c0_60 = arith.constant 0 : index
      %c0_61 = arith.constant 0 : index
      %192 = vector.load %arg10[%c0_60, %c0_61] : memref<2x32xf32, #tpu.memory_space<vmem>>, vector<2x32xf32>
      tpu.vector_store %arg10[%c0_60, %c0_61], %191 {strides = array<i32>} : memref<2x32xf32, #tpu.memory_space<vmem>>, vector<2x32xf32>,
      %c0_62 = arith.constant 0 : index
      %c0_63 = arith.constant 0 : index
      %193 = vector.load %arg8[%c0_62, %c0_63] : memref<32x128xbf16, #tpu.memory_space<vmem>>, vector<32x128xbf16>
      %194 = arith.truncf %191 : vector<2x32xf32> to vector<2x32xbf16>
      %cst_64 = arith.constant dense<0.000000e+00> : vector<2x128xf32>
      %195 = tpu.matmul %194, %193, %cst_64 {dimension_numbers = #tpu.dot_dimension_numbers<[1], [0], [0], [1], [0, 0, 1, 1], [], []>} : vector<2x32xbf16>, vector<32x128xbf16>, vector<2x128xf32> -> vector<2x128xf32>
      %196 = vector.extract_strided_slice %2 {offsets = [3, 0], sizes = [1, 128], strides = [1, 1]} : vector<4x128xf32> to vector<1x128xf32>
      %197 = vector.broadcast %196 : vector<1x128xf32> to vector<2x128xf32>
      %198 = arith.addf %195, %197 : vector<2x128xf32>
      %c0_65 = arith.constant 0 : index
      %c0_66 = arith.constant 0 : index
      %199 = vector.load %arg9[%c0_65, %c0_66] : memref<2x128xf32, #tpu.memory_space<vmem>>, vector<2x128xf32>
      tpu.vector_store %arg9[%c0_65, %c0_66], %198 {strides = array<i32>} : memref<2x128xf32, #tpu.memory_space<vmem>>, vector<2x128xf32>,
    } else {
    }
    return
  }
  func.func @transform_1(%arg0: i32) -> (i32, i32, i32) {
    %c0_i32 = arith.constant 0 : i32
    %c0_i32_0 = arith.constant 0 : i32
    %c0_i32_1 = arith.constant 0 : i32
    %c0_i32_2 = arith.constant 0 : i32
    return %c0_i32, %c0_i32_0, %c0_i32_1 : i32, i32, i32
  }
  func.func @transform_2(%arg0: i32) -> (i32, i32, i32) {
    %c0_i32 = arith.constant 0 : i32
    %c0_i32_0 = arith.constant 0 : i32
    %c0_i32_1 = arith.constant 0 : i32
    return %arg0, %c0_i32, %c0_i32_0 : i32, i32, i32
  }
  func.func @transform_3(%arg0: i32) -> (i32, i32, i32) {
    %c0_i32 = arith.constant 0 : i32
    %c0_i32_0 = arith.constant 0 : i32
    %c0_i32_1 = arith.constant 0 : i32
    return %arg0, %c0_i32, %c0_i32_0 : i32, i32, i32
  }
  func.func @transform_4(%arg0: i32) -> (i32, i32, i32) {
    %c0_i32 = arith.constant 0 : i32
    %c0_i32_0 = arith.constant 0 : i32
    %c0_i32_1 = arith.constant 0 : i32
    return %arg0, %c0_i32, %c0_i32_0 : i32, i32, i32
  }
  func.func @transform_5(%arg0: i32) -> (i32, i32) {
    %c0_i32 = arith.constant 0 : i32
    %c0_i32_0 = arith.constant 0 : i32
    %c0_i32_1 = arith.constant 0 : i32
    return %c0_i32, %c0_i32_0 : i32, i32
  }
  func.func @transform_6(%arg0: i32) -> (i32, i32) {
    %c0_i32 = arith.constant 0 : i32
    %c0_i32_0 = arith.constant 0 : i32
    %c0_i32_1 = arith.constant 0 : i32
    return %c0_i32, %c0_i32_0 : i32, i32
  }
  func.func @transform_7(%arg0: i32) -> (i32, i32) {
    %c0_i32 = arith.constant 0 : i32
    %c0_i32_0 = arith.constant 0 : i32
    %c0_i32_1 = arith.constant 0 : i32
    return %c0_i32, %c0_i32_0 : i32, i32
  }
  func.func @transform_8(%arg0: i32) -> (i32, i32) {
    %c0_i32 = arith.constant 0 : i32
    %c0_i32_0 = arith.constant 0 : i32
    %c0_i32_1 = arith.constant 0 : i32
    return %c0_i32, %c0_i32_0 : i32, i32
  }
  func.func @transform_9(%arg0: i32) -> (i32, i32) {
    %c0_i32 = arith.constant 0 : i32
    %c0_i32_0 = arith.constant 0 : i32
    %c0_i32_1 = arith.constant 0 : i32
    return %c0_i32, %c0_i32_0 : i32, i32
  }
  func.func @transform_10(%arg0: i32) -> (i32, i32, i32) {
    %c0_i32 = arith.constant 0 : i32
    %c0_i32_0 = arith.constant 0 : i32
    %c0_i32_1 = arith.constant 0 : i32
    return %arg0, %c0_i32, %c0_i32_0 : i32, i32, i32
  }
}

</mosaic_0001>

<bundles_post_ra>
// kernel: bert_for_sdgs_forward.1
= control target key start
LH: loop header
LB: loop body
LE: loop exit
PB: predicated region body
PF: predicated region fallthrough
CT: control target
= control target key end

     0   :  { %16 = vsyncpa [#allocation5], 0  ;;  %s3005_s0 = inlined_call_operand.vmem [shape: f32[16,32], index: 0, kind: input, shape index: {}]   ;;  %s3006_s1 = inlined_call_operand.vmem [shape: f32[2,1,8], index: 1, kind: input, shape index: {}]   ;;  %s3007_s2 = inlined_call_operand.vmem [shape: bf16[2,32,192], index: 2, kind: input, shape index: {}]   ;;  %s3008_s3 = inlined_call_operand.vmem [shape: bf16[2,64,32], index: 3, kind: input, shape index: {}]   ;;  %s3009_s4 = inlined_call_operand.vmem [shape: f32[2,8,128], index: 4, kind: input, shape index: {}]   ;;  %s3010_s5 = inlined_call_operand.vmem [shape: f32[4,128], index: 5, kind: input, shape index: {}]   ;;  %s3011_s6 = inlined_call_operand.vmem [shape: bf16[32,32], index: 6, kind: input, shape index: {}]   ;;  %s3012_s7 = inlined_call_operand.vmem [shape: bf16[32,128], index: 7, kind: input, shape index: {}]   ;;  %s3013_s8 = inlined_call_operand.hbm [shape: f32[2,128], index: 8, kind: output, shape index: {0}]   ;;  %s3014_s9 = inlined_call_operand.hbm [shape: f32[2,32], index: 9, kind: output, shape index: {1}]   ;;  %s3015_s10 = inlined_call_operand.vmem [shape: f32[2,16,128], index: 10, kind: output, shape index: {2}]  }
   0x1   :  { %17 = vsyncpa [#allocation7], 0  ;;  %s2585_s13 = smov 0  }
   0x2 LB: > { %s2591_s14 = sadd.s32 4294967295, %s2507_s13   ;;  %p2063_p0 = scmp.ge.s32.totalorder %s2507_s13, 1  ;;  %s2507_s13 = sphi %s2585_s13, %s23_s13  }
   0x3   : > { %p304_p1 = scmp.lt.s32.totalorder %s2507_s13, 3 }
   0x5   : > { %p305_p2 = pnand %p2063_p0, %p304_p1 }
   0x6   : > { %p349_p3 = scmp.lt.s32.totalorder (!%p305_p2), %s2591_s14, 1  ;;  %v2599_v0 = vld [vmem:[%s3010_s5] sm:$0xf] (!%p305_p2)  ;;  %p2071_p4 = scmp.ne.s32.totalorder (!%p305_p2), %s2591_s14, 0 }
   0x7   : > { %308 = sbr.rel (%p305_p2) target bundleno = 4972 (0x136c), region = 48 }
   0xe   : > { %s350_s17 = scalar_select %p349_p3, %s2591_s14, 1 }
   0xf   : > { %374 = sbr.rel (%p2071_p4) target bundleno = 343 (0x157), region = 52  ;;  %v407_v2 = vld [vmem:[%s3005_s0] sm:$0xff] (!%p2071_p4)  ;;  %v409_v3 = vld [vmem:[%s3005_s0 + $0x8] sm:$0xff] (!%p2071_p4) }
  0x10   : > { %s2116_s18 = sshll.u32 %s350_s17, 5  ;;  %s2068_s19 = sshll.u32 %s350_s17, 3  ;;  %408 = vst [vmem:[#allocation2] sm:$0xff] (!%p2071_p4), %v407_v2  ;;  %410 = vst [vmem:[#allocation2 + $0x8] sm:$0xff] (!%p2071_p4), %v409_v3 }
  0x11   : > { %s2605_s22 = scalar_lea.vmem %s3007_s2, %s2116_s18  ;;  %s2610_s25 = scalar_lea.vmem %s3008_s3, %s2116_s18 }
  0x12   : > { %s362_s28 = scalar_lea.vmem %s3009_s4, %s2068_s19  ;;  %s2118_s29 = sshll.u32 %s350_s17, 4 }
  0x13   : > { %s2618_s12 = scalar_lea.vmem %s3015_s10, %s2118_s29  ;;  %v2620_v1 = vld [vmem:[%s362_s28] sm:$0xff] }
  0x16   : > { %418 = vsyncadd [#allocation3], 256 }
  0x17   : > { %2495 = dma.done.wait [#allocation3], 256 }
  0x18   : > { %2496 = vsyncadd [#allocation3], 4294967040  ;;  %vm424_vm0 = vcmask 261120   ;;  %v422_v4 = vld [vmem:[#allocation2] sm:$0xff]  ;;  %v423_v5 = vld [vmem:[#allocation2 + $0x8] sm:$0xff]  ;;  %v452_v20 = vlaneseq }
  0x19   : > { %v425_v6 = vsel %vm424_vm0, %v422_v4, 0.0  ;;  %v428_v7 = vsel %vm424_vm0, %v423_v5, 0.0 }
  0x1a   : > { %426 = vadd.xlane.f32.xlu0 %v425_v6  ;;  %v453_v24 = vshrl.u32 %v452_v20, 7 }
  0x1c   : > { %v454_v26 = vsub.s32 0, %v453_v24  ;;  %v460_v27 = vsub.s32 1, %v453_v24 }
  0x1e   : > { %429 = vadd.xlane.f32.xlu0 %v428_v7  ;;  %v455_v28 = vrot.slane %v2599_v0, %v454_v26  ;;  %v461_v30 = vrot.slane %v2599_v0, %v460_v27 }
  0xa7   : > { %v427_v8 = vpop.xlane.xlu0 %426 }
  0xa8   : > { %v432_v9 = vmul.f32 0.03125, %v427_v8 }
  0xaa   : > { %v434_v10 = vsub.f32 %v422_v4, %v432_v9 }
  0xab   : > { %v430_v11 = vpop.xlane.xlu0 %429 }
  0xac   : > { %v433_v12 = vmul.f32 0.03125, %v430_v11  ;;  %v436_v13 = vmul.f32 %v434_v10, %v434_v10 }
  0xae   : > { %v435_v14 = vsub.f32 %v423_v5, %v433_v12  ;;  %v438_v15 = vsel %vm424_vm0, %v436_v13, 0.0 }
  0xaf   : > { %439 = vadd.xlane.f32.xlu1 %v438_v15 }
  0xb0   : > { %v437_v16 = vmul.f32 %v435_v14, %v435_v14 }
  0xb2   : > { %v441_v17 = vsel %vm424_vm0, %v437_v16, 0.0 }
  0xb3   : > { %442 = vadd.xlane.f32.xlu1 %v441_v17 }
 0x13c   : > { %v440_v18 = vpop.xlane.xlu1 %439 }
 0x13d   : > { %v444_v19 = vmul.f32 0.03125, %v440_v18 }
 0x13f   : > { %v446_v21 = vadd.f32 1e-12, %v444_v19 }
 0x140   : > { %v443_v22 = vpop.xlane.xlu1 %442 }
 0x141   : > { %2360 = vrsqrt.f32 %v446_v21  ;;  %v445_v23 = vmul.f32 0.03125, %v443_v22 }
 0x143   : > { %v447_v25 = vadd.f32 1e-12, %v445_v23 }
 0x145   : > { %2362 = vrsqrt.f32 %v447_v25 }
 0x14b   : > { %v2361_v29 = vpop.eup %2360 }
 0x14c   : > { %v450_v31 = vmul.f32 %v2361_v29, %v434_v10 }
 0x14e   : > { %v456_v32 = vmul.f32 %v455_v28, %v450_v31 }
 0x14f   : > { %v2363_v33 = vpop.eup %2362 }
 0x150   : > { %v462_v34 = vadd.f32 %v461_v30, %v456_v32  ;;  %v451_v35 = vmul.f32 %v2363_v33, %v435_v14 }
 0x152   : > { %464 = vst.msk [vmem:[#allocation2] sm:$0xff] %vm424_vm0, %v462_v34  ;;  %v457_v36 = vmul.f32 %v455_v28, %v451_v35 }
 0x154   : > { %v463_v37 = vadd.f32 %v461_v30, %v457_v36 }
 0x156   : > { %465 = vst.msk [vmem:[#allocation2 + $0x8] sm:$0xff] %vm424_vm0, %v463_v37 }
 0x157 PF: > { %v2638_v38 = vld [vmem:[%s2605_s22] ss:$8 sps:$4 sm:$0xff]   ;;  %v2509_v39 = vmov 0.0   ;;  %vm2510_vm1 = vmmov 0   ;;  %v2645_v40 = vld [vmem:[%s2605_s22 + $0x10] ss:$8 sps:$4 sm:$0xff]   ;;  %v473_v44 = vlaneseq }
 0x158   : > { %2171 = vmatprep.subr.bf16.mxu0 %v2509_v39  ;;  %2175 = vmatprep.mubr.msk.bf16.mxu0 %vm2510_vm1, %v2509_v39  ;;  %vm489_vm2 = vcmask 261120   ;;  %s2511_s17 = smov 96   ;;  %vm553_vm3 = vcmask 64512   ;;  %v2687_v60 = vld [vmem:[%s3006_s1] ss:$0 sm:$0xff]  ;;  %s2512_s26 = smov 64  }
 0x159   : > { %2172 = vmatpush3.bf16.msra.mxu0 %v2638_v38  ;;  %v2647_v41 = vld [vmem:[#allocation2] sm:$0xff]  ;;  %2179 = vmatprep.subr.bf16.mxu1 %v2509_v39  ;;  %v2662_v45 = vshrl.u32 %v473_v44, 7  ;;  %s2513_s27 = smov 88   ;;  %vm678_vm4 = vcmask 1043456   ;;  %s2514_s28 = smov 120   ;;  %vm1456_vm5 = vcmask 130048  }
 0x15a   : > { %2173 = vmatprep.subr.bf16.mxu0 %v2509_v39  ;;  %2181 = vmatprep.mubr.msk.bf16.mxu1 %vm2510_vm1, %v2509_v39  ;;  %v2693_v3 = vld [vmem:[%s3006_s1 + $0x1] ss:$0 sm:$0xff]  ;;  %s2515_s29 = smov 56   ;;  %s2516_s30 = smov 80   ;;  %vm1459_vm6 = vcmask 195584   ;;  %vm1696_vm7 = vcmask 523264  }
 0x15b   : > { %v475_v46 = vsub.s32 0, %v2662_v45  ;;  %s2517_s11 = smov 112   ;;  %s2518_s15 = smov 48  }
 0x15c   : > { %s2519_s16 = smov 72   ;;  %s2520_s18 = smov 104  }
 0x15d   : > { %v2651_v42 = vld [vmem:[#allocation2 + $0x8] sm:$0xff]  ;;  %2174 = vmatpush3.bf16.msra.mxu0 %v2645_v40  ;;  %v476_v47 = vrot.slane %v2620_v1, %v475_v46  ;;  %s2521_s20 = smov 40   ;;  %s2523_s19 = smov 8  }
 0x15e   : > { %v472_v43 = vpack.c.bf16 %v2651_v42, %v2647_v41  ;;  %2185 = vmatprep.subr.bf16.mxu0 %v2509_v39  ;;  %s2524_s21 = smov 16   ;;  %p2102_p5 = scmp.ne.s32.totalorder %s2591_s14, 1 }
 0x15f   : > { %vm2527_vm8 = vmmov (!%p2102_p5), 0   ;;  %vm1853_vm9 = vcmask (!%p2102_p5), 254976  }
 0x160   : > { %2176 = vmatmul.mubr.msk.bf16.vlgmr.msra.gmra.mrb[0].mxu0 %vm489_vm2, %v472_v43 }
 0x161   : > { %2187 = vmatprep.mubr.msk.bf16.mxu0 %vm2510_vm1, %v2509_v39 }
 0x233   : > { %v527_v48 = vpop.f32.mrb[0].mxu0 }
 0x234   : > { %v528_v49 = vadd.f32 %v527_v48, %v476_v47  ;;  %v2177_v50 = vpop.f32.mrb[1].mxu0 }
 0x235   : > { %v530_v51 = vpop.f32.mrb[2].mxu0 }
 0x236   : > { %v2666_v52 = vpack.c.bf16 %v528_v49, %v528_v49  ;;  %v531_v53 = vadd.f32 %v530_v51, %v476_v47  ;;  %v2178_v54 = vpop.f32.mrb[3].mxu0 }
 0x238   : > { %551 = vrot.lane.b32.xlu0 %v2666_v52, %s2511_s17  ;;  %v2669_v55 = vpack.c.bf16 %v531_v53, %v531_v53 }
 0x23c   : > { %601 = vrot.lane.b32.xlu0 %v2669_v55, %s2511_s17  ;;  %s2522_s17 = smov 32  }
 0x2aa   : > { %v552_v56 = vpop.permute.xlu0 %551 }
 0x2ab   : > { %v558_v57 = vsel %vm553_vm3, %v552_v56, 0 }
 0x2ac   : > { %2180 = vmatpush3.bf16.xpose.msra.mxu1 %v558_v57 }
 0x2ad   : > { %2191 = vmatprep.subr.bf16.mxu1 %v2509_v39 }
 0x2ae   : > { %v602_v58 = vpop.permute.xlu0 %601 }
 0x2af   : > { %v607_v59 = vsel %vm553_vm3, %v602_v58, 0 }
 0x2b0   : > { %2186 = vmatpush3.bf16.xpose.msra.mxu0 %v607_v59 }
 0x2b1   : > { %2197 = vmatprep.subr.bf16.mxu0 %v2509_v39 }
 0x2b3   : > { %2182 = vmatmul.mubr.msk.bf16.vlgmr.msra.gmra.mrb[0].mxu1 %vm553_vm3, %v2666_v52 }
 0x2b4   : > { %2193 = vmatprep.mubr.msk.bf16.mxu1 %vm2510_vm1, %v2509_v39 }
 0x2b7   : > { %2188 = vmatmul.mubr.msk.bf16.vlgmr.msra.gmra.mrb[4].mxu0 %vm553_vm3, %v2669_v55 }
 0x2b8   : > { %2199 = vmatprep.mubr.msk.bf16.mxu0 %vm2510_vm1, %v2509_v39 }
 0x386   : > { %v594_v61 = vpop.f32.mrb[0].mxu1 }
 0x387   : > { %v595_v62 = vadd.f32 %v2687_v60, %v594_v61  ;;  %v2183_v63 = vpop.f32.mrb[1].mxu1 }
 0x388   : > { %v597_v2 = vpop.f32.mrb[2].mxu1 }
 0x389   : > { %v2184_v4 = vpop.f32.mrb[3].mxu1  ;;  %v649_v5 = vsel %vm553_vm3, %v595_v62, -inf }
 0x38a   : > { %650 = vmax.xlane.f32.xlu1 %v649_v5  ;;  %v643_v6 = vpop.f32.mrb[4].mxu0 }
 0x38b   : > { %v644_v7 = vadd.f32 %v2693_v3, %v643_v6  ;;  %v2189_v8 = vpop.f32.mrb[5].mxu0 }
 0x38c   : > { %v646_v9 = vpop.f32.mrb[6].mxu0 }
 0x38d   : > { %v2190_v10 = vpop.f32.mrb[7].mxu0  ;;  %v652_v11 = vsel %vm553_vm3, %v644_v7, -inf }
 0x38e   : > { %653 = vmax.xlane.f32.xlu1 %v652_v11 }
 0x39f   : > { %673 = vrot.lane.b32.xlu1 %v2666_v52, %s2512_s26 }
 0x3a3   : > { %722 = vrot.lane.b32.xlu1 %v2669_v55, %s2512_s26 }
 0x3a7   : > { %772 = vrot.lane.b32.xlu1 %v2666_v52, %s2513_s27 }
 0x417   : > { %v651_v12 = vpop.xlane.xlu1 %650 }
 0x418   : > { %v655_v13 = vsub.f32 %v595_v62, %v651_v12 }
 0x41a   : > { %v657_v14 = vmul.f32 1.442695, %v655_v13 }
 0x41b   : > { %v654_v15 = vpop.xlane.xlu1 %653 }
 0x41c   : > { %2389 = vpow2.f32 %v657_v14  ;;  %v656_v16 = vsub.f32 %v644_v7, %v654_v15 }
 0x41e   : > { %v659_v17 = vmul.f32 1.442695, %v656_v16 }
 0x41f   : > { %v674_v18 = vpop.permute.xlu1 %673 }
 0x420   : > { %2391 = vpow2.f32 %v659_v17  ;;  %v680_v19 = vsel %vm678_vm4, %v674_v18, 0 }
 0x421   : > { %2192 = vmatpush3.bf16.msra.mxu1 %v680_v19 }
 0x422   : > { %2203 = vmatprep.subr.bf16.mxu1 %v2509_v39 }
 0x423   : > { %v723_v20 = vpop.permute.xlu1 %722 }
 0x424   : > { %v728_v21 = vsel %vm678_vm4, %v723_v20, 0 }
 0x425   : > { %2198 = vmatpush3.bf16.msra.mxu0 %v728_v21 }
 0x426   : > { %v2390_v22 = vpop.eup %2389  ;;  %2209 = vmatprep.subr.bf16.mxu0 %v2509_v39 }
 0x427   : > { %v661_v23 = vsel %vm553_vm3, %v2390_v22, 0.0  ;;  %v773_v26 = vpop.permute.xlu1 %772 }
 0x428   : > { %662 = vadd.xlane.f32.xlu0 %v661_v23  ;;  %v778_v33 = vsel %vm553_vm3, %v773_v26, 0 }
 0x42a   : > { %v2392_v24 = vpop.eup %2391 }
 0x42b   : > { %v664_v25 = vsel %vm553_vm3, %v2392_v24, 0.0 }
 0x42c   : > { %665 = vadd.xlane.f32.xlu1 %v664_v25 }
 0x43d   : > { %822 = vrot.lane.b32.xlu1 %v2669_v55, %s2513_s27 }
 0x43e   : > { %770 = vrot.lane.b32.xlu0 %v2666_v52, %s2514_s28 }
 0x441   : > { %820 = vrot.lane.b32.xlu1 %v2669_v55, %s2514_s28 }
 0x4b5   : > { %v663_v27 = vpop.xlane.xlu0 %662 }
 0x4b6   : > { %2393 = vrcp.f32 %v663_v27 }
 0x4b9   : > { %v666_v28 = vpop.xlane.xlu1 %665  ;;  %v771_v43 = vpop.permute.xlu0 %770 }
 0x4ba   : > { %2395 = vrcp.f32 %v666_v28 }
 0x4bd   : > { %v823_v35 = vpop.permute.xlu1 %822 }
 0x4be   : > { %v828_v37 = vsel %vm553_vm3, %v823_v35, 0 }
 0x4c0   : > { %v2394_v29 = vpop.eup %2393 }
 0x4c1   : > { %v2710_v30 = vmul.f32 %v2394_v29, %v2390_v22  ;;  %v821_v44 = vpop.permute.xlu1 %820 }
 0x4c3   : > { %v671_v31 = vpack.c.bf16 %v2710_v30, %v2710_v30 }
 0x4c4   : > { %v2396_v32 = vpop.eup %2395 }
 0x4c5   : > { %v2715_v34 = vmul.f32 %v2396_v32, %v2392_v24  ;;  %2194 = vmatmul.mubr.msk.bf16.vlgmr.msra.gmra.mrb[4].mxu1 %vm553_vm3, %v671_v31 }
 0x4c6   : > { %2204 = vmatpush3.bf16.xpose.msra.mxu1 %v778_v33  ;;  %2205 = vmatprep.mubr.msk.bf16.mxu1 %vm2510_vm1, %v2509_v39 }
 0x4c7   : > { %v672_v36 = vpack.c.bf16 %v2715_v34, %v2715_v34  ;;  %2215 = vmatprep.subr.bf16.mxu1 %v2509_v39 }
 0x4c9   : > { %2200 = vmatmul.mubr.msk.bf16.vlgmr.msra.gmra.mrb[8].mxu0 %vm553_vm3, %v672_v36 }
 0x4ca   : > { %2210 = vmatpush3.bf16.xpose.msra.mxu0 %v828_v37  ;;  %2211 = vmatprep.mubr.msk.bf16.mxu0 %vm2510_vm1, %v2509_v39 }
 0x4cb   : > { %2221 = vmatprep.subr.bf16.mxu0 %v2509_v39 }
 0x4cd   : > { %2206 = vmatmul.mubr.msk.bf16.vlgmr.msra.gmra.mrb[8].mxu1 %vm553_vm3, %v771_v43 }
 0x4ce   : > { %2217 = vmatprep.mubr.msk.bf16.mxu1 %vm2510_vm1, %v2509_v39 }
 0x4d1   : > { %2212 = vmatmul.mubr.msk.bf16.vlgmr.msra.gmra.mrb[12].mxu0 %vm553_vm3, %v821_v44 }
 0x4d2   : > { %2223 = vmatprep.mubr.msk.bf16.mxu0 %vm2510_vm1, %v2509_v39 }
 0x598   : > { %v2734_v46 = vpop.f32.mrb[4].mxu1 }
 0x599   : > { %v2195_v47 = vpop.f32.mrb[5].mxu1 }
 0x59a   : > { %v719_v48 = vpop.f32.mrb[6].mxu1 }
 0x59b   : > { %v2196_v49 = vpop.f32.mrb[7].mxu1 }
 0x59c   : > { %v2736_v50 = vpop.f32.mrb[8].mxu0 }
 0x59d   : > { %v2201_v51 = vpop.f32.mrb[9].mxu0 }
 0x59e   : > { %v767_v53 = vpop.f32.mrb[10].mxu0 }
 0x59f   : > { %v2202_v54 = vpop.f32.mrb[11].mxu0 }
 0x5a0   : > { %v814_v56 = vpop.f32.mrb[8].mxu1 }
 0x5a1   : > { %v815_v57 = vadd.f32 %v2687_v60, %v814_v56  ;;  %v2207_v58 = vpop.f32.mrb[9].mxu1 }
 0x5a2   : > { %v817_v59 = vpop.f32.mrb[10].mxu1 }
 0x5a3   : > { %v2208_v61 = vpop.f32.mrb[11].mxu1  ;;  %v870_v62 = vsel %vm553_vm3, %v815_v57, -inf }
 0x5a4   : > { %871 = vmax.xlane.f32.xlu1 %v870_v62  ;;  %v864_v63 = vpop.f32.mrb[12].mxu0 }
 0x5a5   : > { %v865_v2 = vadd.f32 %v2693_v3, %v864_v63  ;;  %v2213_v4 = vpop.f32.mrb[13].mxu0 }
 0x5a6   : > { %v867_v5 = vpop.f32.mrb[14].mxu0 }
 0x5a7   : > { %v2214_v6 = vpop.f32.mrb[15].mxu0  ;;  %v873_v7 = vsel %vm553_vm3, %v865_v2, -inf }
 0x5a8   : > { %874 = vmax.xlane.f32.xlu0 %v873_v7 }
 0x5b5   : > { %894 = vrot.lane.b32.xlu1 %v2666_v52, %s2515_s29 }
 0x5b9   : > { %992 = vrot.lane.b32.xlu1 %v2666_v52, %s2516_s30 }
 0x5be   : > { %942 = vrot.lane.b32.xlu0 %v2669_v55, %s2515_s29 }
 0x5c2   : > { %990 = vrot.lane.b32.xlu0 %v2666_v52, %s2517_s11 }
 0x631   : > { %v872_v8 = vpop.xlane.xlu1 %871 }
 0x632   : > { %v876_v9 = vsub.f32 %v815_v57, %v872_v8 }
 0x634   : > { %v878_v10 = vmul.f32 1.442695, %v876_v9 }
 0x635   : > { %v895_v11 = vpop.permute.xlu1 %894  ;;  %v875_v12 = vpop.xlane.xlu0 %874 }
 0x636   : > { %2397 = vpow2.f32 %v878_v10  ;;  %v900_v13 = vsel %vm678_vm4, %v895_v11, 0  ;;  %v877_v14 = vsub.f32 %v865_v2, %v875_v12 }
 0x637   : > { %2216 = vmatpush3.bf16.msra.mxu1 %v900_v13 }
 0x638   : > { %v880_v15 = vmul.f32 1.442695, %v877_v14  ;;  %2227 = vmatprep.subr.bf16.mxu1 %v2509_v39 }
 0x639   : > { %v943_v16 = vpop.permute.xlu0 %942  ;;  %v993_v22 = vpop.permute.xlu1 %992 }
 0x63a   : > { %2399 = vpow2.f32 %v880_v15  ;;  %v948_v17 = vsel %vm678_vm4, %v943_v16, 0  ;;  %v998_v29 = vsel %vm553_vm3, %v993_v22, 0 }
 0x63b   : > { %2222 = vmatpush3.bf16.msra.mxu0 %v948_v17 }
 0x63c   : > { %2233 = vmatprep.subr.bf16.mxu0 %v2509_v39 }
 0x63d   : > { %v991_v36 = vpop.permute.xlu0 %990 }
 0x640   : > { %v2398_v18 = vpop.eup %2397 }
 0x641   : > { %v882_v19 = vsel %vm553_vm3, %v2398_v18, 0.0 }
 0x642   : > { %883 = vadd.xlane.f32.xlu1 %v882_v19 }
 0x644   : > { %v2400_v20 = vpop.eup %2399 }
 0x645   : > { %v885_v21 = vsel %vm553_vm3, %v2400_v20, 0.0 }
 0x646   : > { %886 = vadd.xlane.f32.xlu1 %v885_v21 }
 0x657   : > { %1042 = vrot.lane.b32.xlu1 %v2669_v55, %s2516_s30 }
 0x65b   : > { %1040 = vrot.lane.b32.xlu1 %v2669_v55, %s2517_s11 }
 0x6cf   : > { %v884_v23 = vpop.xlane.xlu1 %883 }
 0x6d0   : > { %2401 = vrcp.f32 %v884_v23 }
 0x6d3   : > { %v887_v24 = vpop.xlane.xlu1 %886 }
 0x6d4   : > { %2403 = vrcp.f32 %v887_v24 }
 0x6d7   : > { %v1043_v32 = vpop.permute.xlu1 %1042 }
 0x6d8   : > { %v1048_v35 = vsel %vm553_vm3, %v1043_v32, 0 }
 0x6da   : > { %v2402_v25 = vpop.eup %2401 }
 0x6db   : > { %v2754_v26 = vmul.f32 %v2402_v25, %v2398_v18  ;;  %v1041_v37 = vpop.permute.xlu1 %1040 }
 0x6dd   : > { %v892_v27 = vpack.c.bf16 %v2754_v26, %v2754_v26 }
 0x6de   : > { %v2404_v28 = vpop.eup %2403 }
 0x6df   : > { %v2759_v31 = vmul.f32 %v2404_v28, %v2400_v20  ;;  %2218 = vmatmul.mubr.msk.bf16.vlgmr.msra.gmra.mrb[12].mxu1 %vm553_vm3, %v892_v27 }
 0x6e0   : > { %2228 = vmatpush3.bf16.xpose.msra.mxu1 %v998_v29  ;;  %2229 = vmatprep.mubr.msk.bf16.mxu1 %vm2510_vm1, %v2509_v39 }
 0x6e1   : > { %v893_v33 = vpack.c.bf16 %v2759_v31, %v2759_v31  ;;  %2239 = vmatprep.subr.bf16.mxu1 %v2509_v39 }
 0x6e3   : > { %2224 = vmatmul.mubr.msk.bf16.vlgmr.msra.gmra.mrb[16].mxu0 %vm553_vm3, %v893_v33 }
 0x6e4   : > { %2234 = vmatpush3.bf16.xpose.msra.mxu0 %v1048_v35  ;;  %2235 = vmatprep.mubr.msk.bf16.mxu0 %vm2510_vm1, %v2509_v39 }
 0x6e5   : > { %2245 = vmatprep.subr.bf16.mxu0 %v2509_v39 }
 0x6e7   : > { %2230 = vmatmul.mubr.msk.bf16.vlgmr.msra.gmra.mrb[16].mxu1 %vm553_vm3, %v991_v36 }
 0x6e8   : > { %2241 = vmatprep.mubr.msk.bf16.mxu1 %vm2510_vm1, %v2509_v39 }
 0x6eb   : > { %2236 = vmatmul.mubr.msk.bf16.vlgmr.msra.gmra.mrb[20].mxu0 %vm553_vm3, %v1041_v37 }
 0x6ec   : > { %2247 = vmatprep.mubr.msk.bf16.mxu0 %vm2510_vm1, %v2509_v39 }
 0x7b2   : > { %v2778_v43 = vpop.f32.mrb[12].mxu1 }
 0x7b3   : > { %v2219_v44 = vpop.f32.mrb[13].mxu1 }
 0x7b4   : > { %v939_v47 = vpop.f32.mrb[14].mxu1 }
 0x7b5   : > { %v2220_v48 = vpop.f32.mrb[15].mxu1 }
 0x7b6   : > { %v2780_v49 = vpop.f32.mrb[16].mxu0 }
 0x7b7   : > { %v2364_v51 = vpack.i.bf16 %v2780_v49, %v2778_v43  ;;  %v2225_v53 = vpop.f32.mrb[17].mxu0 }
 0x7b8   : > { %v987_v54 = vpop.f32.mrb[18].mxu0 }
 0x7b9   : > { %v2226_v56 = vpop.f32.mrb[19].mxu0 }
 0x7ba   : > { %v1034_v57 = vpop.f32.mrb[16].mxu1 }
 0x7bb   : > { %v1035_v58 = vadd.f32 %v2687_v60, %v1034_v57  ;;  %v2231_v59 = vpop.f32.mrb[17].mxu1 }
 0x7bc   : > { %v1037_v61 = vpop.f32.mrb[18].mxu1 }
 0x7bd   : > { %v2232_v62 = vpop.f32.mrb[19].mxu1  ;;  %v1090_v63 = vsel %vm553_vm3, %v1035_v58, -inf }
 0x7be   : > { %1091 = vmax.xlane.f32.xlu0 %v1090_v63  ;;  %v1084_v2 = vpop.f32.mrb[20].mxu0 }
 0x7bf   : > { %v1085_v4 = vadd.f32 %v2693_v3, %v1084_v2  ;;  %v2237_v5 = vpop.f32.mrb[21].mxu0 }
 0x7c0   : > { %v1087_v6 = vpop.f32.mrb[22].mxu0 }
 0x7c1   : > { %v2238_v7 = vpop.f32.mrb[23].mxu0  ;;  %v1093_v8 = vsel %vm553_vm3, %v1085_v4, -inf }
 0x7c2   : > { %1094 = vmax.xlane.f32.xlu1 %v1093_v8 }
 0x7d3   : > { %1114 = vrot.lane.b32.xlu1 %v2666_v52, %s2518_s15 }
 0x7d7   : > { %1212 = vrot.lane.b32.xlu1 %v2666_v52, %s2519_s16 }
 0x7db   : > { %1262 = vrot.lane.b32.xlu1 %v2669_v55, %s2519_s16 }
 0x7df   : > { %1260 = vrot.lane.b32.xlu1 %v2669_v55, %s2520_s18 }
 0x84b   : > { %v1092_v9 = vpop.xlane.xlu0 %1091 }
 0x84c   : > { %v1096_v10 = vsub.f32 %v1035_v58, %v1092_v9 }
 0x84e   : > { %v1098_v11 = vmul.f32 1.442695, %v1096_v10 }
 0x84f   : > { %v1095_v12 = vpop.xlane.xlu1 %1094 }
 0x850   : > { %2405 = vpow2.f32 %v1098_v11  ;;  %v1097_v13 = vsub.f32 %v1085_v4, %v1095_v12 }
 0x852   : > { %v1100_v14 = vmul.f32 1.442695, %v1097_v13 }
 0x853   : > { %v1115_v15 = vpop.permute.xlu1 %1114 }
 0x854   : > { %2407 = vpow2.f32 %v1100_v14  ;;  %v1120_v16 = vsel %vm678_vm4, %v1115_v15, 0 }
 0x855   : > { %2240 = vmatpush3.bf16.msra.mxu1 %v1120_v16 }
 0x856   : > { %2251 = vmatprep.subr.bf16.mxu1 %v2509_v39 }
 0x857   : > { %v1213_v27 = vpop.permute.xlu1 %1212 }
 0x858   : > { %v1218_v33 = vsel %vm553_vm3, %v1213_v27, 0 }
 0x85a   : > { %v2406_v17 = vpop.eup %2405 }
 0x85b   : > { %v1102_v18 = vsel %vm553_vm3, %v2406_v17, 0.0  ;;  %v1263_v36 = vpop.permute.xlu1 %1262 }
 0x85c   : > { %1103 = vadd.xlane.f32.xlu0 %v1102_v18  ;;  %v1268_v44 = vsel %vm553_vm3, %v1263_v36, 0  ;;  %v2384_v36 = vld [vmem:[%s2605_s22 + $0x14] ss:$8 sps:$4 sm:$0xff]  }
 0x85e   : > { %v2408_v19 = vpop.eup %2407 }
 0x85f   : > { %v1105_v20 = vsel %vm553_vm3, %v2408_v19, 0.0  ;;  %v1261_v48 = vpop.permute.xlu1 %1260 }
 0x860   : > { %1106 = vadd.xlane.f32.xlu0 %v1105_v20 }
 0x876   : > { %1162 = vrot.lane.b32.xlu0 %v2669_v55, %s2518_s15 }
 0x87a   : > { %1210 = vrot.lane.b32.xlu0 %v2666_v52, %s2520_s18 }
 0x8e9   : > { %v1104_v21 = vpop.xlane.xlu0 %1103 }
 0x8ea   : > { %2409 = vrcp.f32 %v1104_v21 }
 0x8ed   : > { %v1107_v22 = vpop.xlane.xlu0 %1106 }
 0x8ee   : > { %2411 = vrcp.f32 %v1107_v22 }
 0x8f1   : > { %v1163_v23 = vpop.permute.xlu0 %1162 }
 0x8f2   : > { %v1168_v24 = vsel %vm678_vm4, %v1163_v23, 0 }
 0x8f3   : > { %2246 = vmatpush3.bf16.msra.mxu0 %v1168_v24 }
 0x8f4   : > { %v2410_v25 = vpop.eup %2409  ;;  %2257 = vmatprep.subr.bf16.mxu0 %v2509_v39 }
 0x8f5   : > { %v2800_v28 = vmul.f32 %v2410_v25, %v2406_v17  ;;  %v1211_v47 = vpop.permute.xlu0 %1210 }
 0x8f7   : > { %v1112_v29 = vpack.c.bf16 %v2800_v28, %v2800_v28 }
 0x8f8   : > { %v2412_v32 = vpop.eup %2411 }
 0x8f9   : > { %v2805_v35 = vmul.f32 %v2412_v32, %v2408_v19  ;;  %2242 = vmatmul.mubr.msk.bf16.vlgmr.msra.gmra.mrb[20].mxu1 %vm553_vm3, %v1112_v29  ;;  %v2381_v32 = vld [vmem:[%s2605_s22 + $0x4] ss:$8 sps:$4 sm:$0xff]   ;;  %s2525_s22 = smov 24  }
 0x8fa   : > { %2252 = vmatpush3.bf16.xpose.msra.mxu1 %v1218_v33  ;;  %2253 = vmatprep.mubr.msk.bf16.mxu1 %vm2510_vm1, %v2509_v39 }
 0x8fb   : > { %v1113_v37 = vpack.c.bf16 %v2805_v35, %v2805_v35  ;;  %2263 = vmatprep.subr.bf16.mxu1 %v2509_v39 }
 0x8fd   : > { %2248 = vmatmul.mubr.msk.bf16.vlgmr.msra.gmra.mrb[24].mxu0 %vm553_vm3, %v1113_v37 }
 0x8fe   : > { %2258 = vmatpush3.bf16.xpose.msra.mxu0 %v1268_v44  ;;  %2259 = vmatprep.mubr.msk.bf16.mxu0 %vm2510_vm1, %v2509_v39 }
 0x8ff   : > { %2269 = vmatprep.subr.bf16.mxu0 %v2509_v39 }
 0x901   : > { %2254 = vmatmul.mubr.msk.bf16.vlgmr.msra.gmra.mrb[24].mxu1 %vm553_vm3, %v1211_v47 }
 0x902   : > { %2265 = vmatprep.mubr.msk.bf16.mxu1 %vm2510_vm1, %v2509_v39 }
 0x905   : > { %2260 = vmatmul.mubr.msk.bf16.vlgmr.msra.gmra.mrb[28].mxu0 %vm553_vm3, %v1261_v48 }
 0x906   : > { %2271 = vmatprep.mubr.msk.bf16.mxu0 %vm2510_vm1, %v2509_v39 }
 0x9cc   : > { %v1156_v53 = vpop.f32.mrb[20].mxu1 }
 0x9cd   : > { %v2243_v54 = vpop.f32.mrb[21].mxu1 }
 0x9ce   : > { %v1159_v56 = vpop.f32.mrb[22].mxu1 }
 0x9cf   : > { %v2244_v57 = vpop.f32.mrb[23].mxu1 }
 0x9d0   : > { %v1204_v58 = vpop.f32.mrb[24].mxu0 }
 0x9d1   : > { %v2369_v59 = vpack.i.bf16 %v1204_v58, %v1156_v53  ;;  %v2249_v61 = vpop.f32.mrb[25].mxu0 }
 0x9d2   : > { %v1207_v62 = vpop.f32.mrb[26].mxu0 }
 0x9d3   : > { %v2250_v63 = vpop.f32.mrb[27].mxu0 }
 0x9d4   : > { %v1254_v2 = vpop.f32.mrb[24].mxu1 }
 0x9d5   : > { %v1255_v4 = vadd.f32 %v2687_v60, %v1254_v2  ;;  %v2255_v5 = vpop.f32.mrb[25].mxu1 }
 0x9d6   : > { %v1257_v6 = vpop.f32.mrb[26].mxu1 }
 0x9d7   : > { %v2256_v7 = vpop.f32.mrb[27].mxu1  ;;  %v1310_v8 = vsel %vm553_vm3, %v1255_v4, -inf }
 0x9d8   : > { %1311 = vmax.xlane.f32.xlu0 %v1310_v8  ;;  %v1304_v9 = vpop.f32.mrb[28].mxu0 }
 0x9d9   : > { %v1305_v10 = vadd.f32 %v2693_v3, %v1304_v9  ;;  %v2261_v11 = vpop.f32.mrb[29].mxu0 }
 0x9da   : > { %v1307_v12 = vpop.f32.mrb[30].mxu0 }
 0x9db   : > { %v2262_v13 = vpop.f32.mrb[31].mxu0  ;;  %v1313_v14 = vsel %vm553_vm3, %v1305_v10, -inf }
 0x9dc   : > { %1314 = vmax.xlane.f32.xlu1 %v1313_v14 }
 0x9ed   : > { %1334 = vrot.lane.b32.xlu1 %v2666_v52, %s2521_s20 }
 0x9f1   : > { %1501 = vrot.lane.b32.xlu1 %v2638_v38, %s2522_s17 }
 0x9f5   : > { %2365 = vrot.lane.b32.xlu1 %v2364_v51, %s2523_s19 }
 0xa65   : > { %v1312_v60 = vpop.xlane.xlu0 %1311 }
 0xa66   : > { %v1316_v3 = vsub.f32 %v1255_v4, %v1312_v60 }
 0xa68   : > { %v1318_v15 = vmul.f32 1.442695, %v1316_v3 }
 0xa69   : > { %v1315_v16 = vpop.xlane.xlu1 %1314 }
 0xa6a   : > { %2413 = vpow2.f32 %v1318_v15  ;;  %v1317_v17 = vsub.f32 %v1305_v10, %v1315_v16 }
 0xa6c   : > { %v1320_v18 = vmul.f32 1.442695, %v1317_v17 }
 0xa6d   : > { %v1335_v19 = vpop.permute.xlu1 %1334 }
 0xa6e   : > { %2415 = vpow2.f32 %v1320_v18  ;;  %v1340_v52 = vsel %vm678_vm4, %v1335_v19, 0 }
 0xa6f   : > { %2264 = vmatpush3.bf16.msra.mxu1 %v1340_v52 }
 0xa70   : > { %2275 = vmatprep.subr.bf16.mxu1 %v2509_v39 }
 0xa74   : > { %v2414_v38 = vpop.eup %2413 }
 0xa75   : > { %v1322_v20 = vsel %vm553_vm3, %v2414_v38, 0.0 }
 0xa76   : > { %1323 = vadd.xlane.f32.xlu0 %v1322_v20 }
 0xa78   : > { %v2416_v43 = vpop.eup %2415 }
 0xa79   : > { %v1325_v49 = vsel %vm553_vm3, %v2416_v43, 0.0 }
 0xa7a   : > { %1326 = vadd.xlane.f32.xlu0 %v1325_v49 }
 0xa90   : > { %1382 = vrot.lane.b32.xlu0 %v2669_v55, %s2521_s20 }
 0xa94   : > { %2370 = vrot.lane.b32.xlu0 %v2369_v59, %s2524_s21 }
 0xa98   : > { %1503 = vrot.lane.b32.xlu0 %v2645_v40, %s2522_s17  ;;  %v1502_v40 = vpop.permute.xlu1 %1501 }
 0xa9c   : > { %v2366_v62 = vpop.permute.xlu1 %2365 }
 0xa9d   : > { %v2368_v63 = vunpack.i.h.bf16 %v2366_v62  ;;  %v2367_v2 = vunpack.i.l.bf16 %v2366_v62 }
 0xa9f   : > { %v1491_v7 = vsel %vm553_vm3, %v2736_v50, %v2368_v63  ;;  %v1490_v8 = vsel %vm553_vm3, %v2734_v46, %v2367_v2  ;;  %v1499_v50 = vsub.s32 1, %v2662_v45 }
 0xaa1   : > { %v1500_v46 = vrot.slane %v2620_v1, %v1499_v50 }
 0xb03   : > { %v1324_v51 = vpop.xlane.xlu0 %1323 }
 0xb04   : > { %2417 = vrcp.f32 %v1324_v51 }
 0xb07   : > { %v1327_v21 = vpop.xlane.xlu0 %1326 }
 0xb08   : > { %2419 = vrcp.f32 %v1327_v21 }
 0xb0b   : > { %v1383_v22 = vpop.permute.xlu0 %1382 }
 0xb0c   : > { %v1388_v23 = vsel %vm678_vm4, %v1383_v22, 0 }
 0xb0d   : > { %2270 = vmatpush3.bf16.msra.mxu0 %v1388_v23 }
 0xb0e   : > { %v2418_v24 = vpop.eup %2417  ;;  %2283 = vmatprep.subr.bf16.mxu0 %v2509_v39 }
 0xb0f   : > { %v2843_v25 = vmul.f32 %v2418_v24, %v2414_v38  ;;  %v2371_v37 = vpop.permute.xlu0 %2370 }
 0xb10   : > { %v2373_v4 = vunpack.i.h.bf16 %v2371_v37  ;;  %v2372_v5 = vunpack.i.l.bf16 %v2371_v37 }
 0xb11   : > { %v1332_v55 = vpack.c.bf16 %v2843_v25, %v2843_v25 }
 0xb12   : > { %v2420_v27 = vpop.eup %2419  ;;  %v1492_v11 = vsel %vm1456_vm5, %v1490_v8, %v2372_v5  ;;  %v1493_v12 = vsel %vm1456_vm5, %v1491_v7, %v2373_v4  ;;  %v2385_v5 = vld [vmem:[%s2610_s25] sm:$0xff]   ;;  %v2387_v7 = vld [vmem:[%s2610_s25 + $0x10] sm:$0xff]   ;;  %v2388_v8 = vld [vmem:[%s2610_s25 + $0x18] sm:$0xff]  }
 0xb13   : > { %v2847_v29 = vmul.f32 %v2420_v27, %v2416_v43  ;;  %2266 = vmatmul.mubr.msk.bf16.vlgmr.msra.gmra.mrb[28].mxu1 %vm553_vm3, %v1332_v55  ;;  %v1504_v44 = vpop.permute.xlu0 %1503 }
 0xb14   : > { %2276 = vmatpush3.bf16.msra.mxu1 %v1502_v40  ;;  %2279 = vmatprep.mubr.msk.bf16.mxu1 %vm2510_vm1, %v2509_v39 }
 0xb15   : > { %v1333_v33 = vpack.c.bf16 %v2847_v29, %v2847_v29  ;;  %2277 = vmatprep.subr.bf16.mxu1 %v2509_v39 }
 0xb17   : > { %2272 = vmatmul.mubr.msk.bf16.vlgmr.msra.gmra.mrb[32].mxu0 %vm553_vm3, %v1333_v33 }
 0xb18   : > { %2284 = vmatpush3.bf16.msra.mxu0 %v2381_v32  ;;  %2287 = vmatprep.mubr.msk.bf16.mxu0 %vm2510_vm1, %v2509_v39 }
 0xb19   : > { %2285 = vmatprep.subr.bf16.mxu0 %v2509_v39  ;;  %2278 = vmatpush3.bf16.msra.mxu1 %v1504_v44 }
 0xb1a   : > { %2291 = vmatprep.subr.bf16.mxu1 %v2509_v39 }
 0xb1c   : > { %2286 = vmatpush3.bf16.msra.mxu0 %v2384_v36 }
 0xbe6   : > { %v1376_v47 = vpop.f32.mrb[28].mxu1 }
 0xbe7   : > { %v2267_v48 = vpop.f32.mrb[29].mxu1 }
 0xbe8   : > { %v1379_v53 = vpop.f32.mrb[30].mxu1 }
 0xbe9   : > { %v2268_v54 = vpop.f32.mrb[31].mxu1  ;;  %v1588_v53 = vsub.s32 3, %v2662_v45 }
 0xbea   : > { %v1424_v56 = vpop.f32.mrb[32].mxu0 }
 0xbeb   : > { %v2374_v57 = vpack.i.bf16 %v1424_v56, %v1376_v47  ;;  %v2273_v58 = vpop.f32.mrb[33].mxu0  ;;  %v1582_v47 = vsub.s32 2, %v2662_v45 }
 0xbec   : > { %v1427_v59 = vpop.f32.mrb[34].mxu0 }
 0xbed   : > { %2375 = vrot.lane.b32.xlu1 %v2374_v57, %s2525_s22  ;;  %v2274_v61 = vpop.f32.mrb[35].mxu0  ;;  %v1583_v48 = vrot.slane %v2620_v1, %v1582_v47 }
 0xbee   : > { %v1589_v61 = vrot.slane %v2620_v1, %v1588_v53 }
 0xc5f   : > { %v2376_v6 = vpop.permute.xlu1 %2375 }
 0xc60   : > { %v2378_v9 = vunpack.i.h.bf16 %v2376_v6  ;;  %v2377_v10 = vunpack.i.l.bf16 %v2376_v6  ;;  %v2386_v6 = vld [vmem:[%s2610_s25 + $0x8] sm:$0xff]  }
 0xc62   : > { %v1495_v13 = vsel %vm1459_vm6, %v1493_v12, %v2378_v9  ;;  %v1494_v14 = vsel %vm1459_vm6, %v1492_v11, %v2377_v10  ;;  %v1595_v9 = vsub.s32 4, %v2662_v45 }
 0xc63   : > { %v1496_v60 = vpack.c.bf16 %v1495_v13, %v1494_v14 }
 0xc64   : > { %v1596_v10 = vrot.slane %v2620_v1, %v1595_v9 }
 0xc65   : > { %2280 = vmatmul.mubr.msk.bf16.vlgmr.msra.gmra.mrb[32].mxu1 %vm489_vm2, %v1496_v60 }
 0xc66   : > { %2299 = vmatprep.mubr.msk.bf16.mxu1 %vm2510_vm1, %v2509_v39  ;;  %2292 = vmatpush3.bf16.msra.mxu1 %v2385_v5 }
 0xc67   : > { %2293 = vmatprep.subr.bf16.mxu1 %v2509_v39 }
 0xc6a   : > { %2294 = vmatpush3.bf16.msra.mxu1 %v2386_v6 }
 0xc6b   : > { %2295 = vmatprep.subr.bf16.mxu1 %v2509_v39 }
 0xc6e   : > { %2296 = vmatpush3.bf16.msra.mxu1 %v2387_v7 }
 0xc6f   : > { %2297 = vmatprep.subr.bf16.mxu1 %v2509_v39 }
 0xc72   : > { %2298 = vmatpush3.bf16.msra.mxu1 %v2388_v8 }
 0xd38   : > { %v1544_v3 = vpop.f32.mrb[32].mxu1 }
 0xd39   : > { %v1545_v15 = vadd.f32 %v1544_v3, %v1500_v46  ;;  %v2281_v16 = vpop.f32.mrb[33].mxu1 }
 0xd3a   : > { %v1547_v17 = vpop.f32.mrb[34].mxu1 }
 0xd3b   : > { %v1548_v18 = vadd.f32 %v1547_v17, %v1500_v46  ;;  %v2282_v19 = vpop.f32.mrb[35].mxu1  ;;  %v1551_v52 = vadd.f32 %v1545_v15, %v2647_v41 }
 0xd3d   : > { %v1553_v38 = vsel %vm489_vm2, %v1551_v52, 0.0  ;;  %v1552_v20 = vadd.f32 %v1548_v18, %v2651_v42 }
 0xd3e   : > { %1554 = vadd.xlane.f32.xlu1 %v1553_v38 }
 0xd3f   : > { %v1556_v43 = vsel %vm489_vm2, %v1552_v20, 0.0 }
 0xd40   : > { %1557 = vadd.xlane.f32.xlu0 %v1556_v43  ;;  %v1670_v43 = vsub.s32 5, %v2662_v45 }
 0xdcb   : > { %v1555_v49 = vpop.xlane.xlu1 %1554 }
 0xdcc   : > { %v1560_v51 = vmul.f32 0.03125, %v1555_v49  ;;  %v1671_v49 = vrot.slane %v2620_v1, %v1670_v43  ;;  %v2436_v43 = vld [vmem:[%s3012_s7 + $0x8] sm:$0xff] (!%p2102_p5)  }
 0xdcd   : > { %v1558_v21 = vpop.xlane.xlu0 %1557 }
 0xdce   : > { %v1562_v22 = vsub.f32 %v1551_v52, %v1560_v51  ;;  %v1561_v23 = vmul.f32 0.03125, %v1558_v21 }
 0xdd0   : > { %v1563_v24 = vsub.f32 %v1552_v20, %v1561_v23  ;;  %v1564_v55 = vmul.f32 %v1562_v22, %v1562_v22 }
 0xdd2   : > { %v1566_v27 = vsel %vm489_vm2, %v1564_v55, 0.0  ;;  %v1565_v40 = vmul.f32 %v1563_v24, %v1563_v24 }
 0xdd3   : > { %1567 = vadd.xlane.f32.xlu0 %v1566_v27 }
 0xdd4   : > { %v1569_v41 = vsel %vm489_vm2, %v1565_v40, 0.0 }
 0xdd5   : > { %1570 = vadd.xlane.f32.xlu1 %v1569_v41 }
 0xe60   : > { %v1568_v32 = vpop.xlane.xlu0 %1567 }
 0xe61   : > { %v1572_v42 = vmul.f32 0.03125, %v1568_v32 }
 0xe62   : > { %v1571_v33 = vpop.xlane.xlu1 %1570 }
 0xe63   : > { %v1574_v36 = vadd.f32 1e-12, %v1572_v42  ;;  %v1573_v37 = vmul.f32 0.03125, %v1571_v33 }
 0xe65   : > { %2421 = vrsqrt.f32 %v1574_v36  ;;  %v1575_v44 = vadd.f32 1e-12, %v1573_v37 }
 0xe67   : > { %2423 = vrsqrt.f32 %v1575_v44 }
 0xe6f   : > { %v2422_v54 = vpop.eup %2421 }
 0xe70   : > { %v1578_v56 = vmul.f32 %v2422_v54, %v1562_v22 }
 0xe71   : > { %v2424_v57 = vpop.eup %2423 }
 0xe72   : > { %v1584_v58 = vmul.f32 %v1583_v48, %v1578_v56  ;;  %v1579_v59 = vmul.f32 %v2424_v57, %v1563_v24 }
 0xe74   : > { %v1585_v62 = vmul.f32 %v1583_v48, %v1579_v59  ;;  %v1590_v63 = vadd.f32 %v1589_v61, %v1584_v58 }
 0xe76   : > { %v1591_v2 = vadd.f32 %v1589_v61, %v1585_v62 }
 0xe78   : > { %v1592_v4 = vpack.c.bf16 %v1591_v2, %v1590_v63 }
 0xe7a   : > { %2288 = vmatmul.mubr.msk.bf16.vlgmr.msra.gmra.mrb[36].mxu0 %vm489_vm2, %v1592_v4 }
 0xf4d   : > { %v1642_v11 = vpop.f32.mrb[36].mxu0 }
 0xf4e   : > { %v1643_v12 = vadd.f32 %v1642_v11, %v1596_v10  ;;  %v2289_v13 = vpop.f32.mrb[37].mxu0 }
 0xf4f   : > { %v1645_v14 = vpop.f32.mrb[38].mxu0  ;;  %v1777_v13 = vsub.s32 7, %v2662_v45 }
 0xf50   : > { %v1651_v60 = vmul.f32 0.70710677, %v1643_v12  ;;  %v1646_v50 = vadd.f32 %v1645_v14, %v1596_v10  ;;  %v2290_v46 = vpop.f32.mrb[39].mxu0  ;;  %v1649_v39 = vmul.f32 0.5, %v1643_v12 }
 0xf52   : > { %2425 = verf.f32 %v1651_v60  ;;  %v1652_v3 = vmul.f32 0.70710677, %v1646_v50  ;;  %v1650_v18 = vmul.f32 0.5, %v1646_v50  ;;  %v1778_v60 = vrot.slane %v2620_v1, %v1777_v13 }
 0xf54   : > { %2427 = verf.f32 %v1652_v3 }
 0xf5c   : > { %v2426_v15 = vpop.eup %2425 }
 0xf5d   : > { %v1655_v16 = vadd.f32 1.0, %v2426_v15 }
 0xf5e   : > { %v2428_v17 = vpop.eup %2427 }
 0xf5f   : > { %v1656_v19 = vadd.f32 1.0, %v2428_v17  ;;  %v1657_v52 = vmul.f32 %v1655_v16, %v1649_v39 }
 0xf61   : > { %v1658_v38 = vmul.f32 %v1656_v19, %v1650_v18  ;;  %v2433_v18 = vld [vmem:[%s3011_s6] sm:$0xff] (!%p2102_p5)   ;;  %v2526_v19 = vmov (!%p2102_p5), 0.0  }
 0xf62   : > { %2303 = vmatprep.subr.bf16.mxu0 (!%p2102_p5), %v2526_v19  ;;  %2311 = vmatprep.subr.bf16.mxu1 (!%p2102_p5), %v2526_v19 }
 0xf63   : > { %v1667_v20 = vpack.c.bf16 %v1658_v38, %v1657_v52  ;;  %2304 = vmatpush3.bf16.msra.mxu0 (!%p2102_p5), %v2433_v18  ;;  %2307 = vmatprep.mubr.msk.bf16.mxu0 (!%p2102_p5), %vm2527_vm8, %v2526_v19 }
 0xf64   : > { %2305 = vmatprep.subr.bf16.mxu0 (!%p2102_p5), %v2526_v19 }
 0xf65   : > { %2300 = vmatmul.mubr.msk.bf16.vlgmr.msra.gmra.mrb[36].mxu1 %vm1696_vm7, %v1667_v20  ;;  %v2435_v20 = vld [vmem:[%s3012_s7] sm:$0xff] (!%p2102_p5)  }
 0xf66   : > { %2315 = vmatprep.mubr.msk.bf16.mxu1 (!%p2102_p5), %vm2527_vm8, %v2526_v19  ;;  %2312 = vmatpush3.bf16.msra.mxu1 (!%p2102_p5), %v2435_v20 }
 0xf67   : > { %2313 = vmatprep.subr.bf16.mxu1 (!%p2102_p5), %v2526_v19 }
 0xf6a   : > { %2314 = vmatpush3.bf16.msra.mxu1 (!%p2102_p5), %v2436_v43 }
0x1038   : > { %v1734_v51 = vpop.f32.mrb[36].mxu1 }
0x1039   : > { %v1735_v21 = vadd.f32 %v1734_v51, %v1671_v49  ;;  %v2301_v22 = vpop.f32.mrb[37].mxu1 }
0x103a   : > { %v1737_v23 = vpop.f32.mrb[38].mxu1 }
0x103b   : > { %v1738_v24 = vadd.f32 %v1737_v23, %v1671_v49  ;;  %v2302_v55 = vpop.f32.mrb[39].mxu1  ;;  %v1741_v27 = vadd.f32 %v1735_v21, %v1590_v63  ;;  %v1796_v49 = vrot.slane (!%p2102_p5), %v2599_v0, %v1582_v47 }
0x103d   : > { %v1743_v40 = vsel %vm489_vm2, %v1741_v27, 0.0  ;;  %v1742_v41 = vadd.f32 %v1738_v24, %v1591_v2 }
0x103e   : > { %1744 = vadd.xlane.f32.xlu0 %v1743_v40  ;;  %v1863_v40 = vrot.slane (!%p2102_p5), %v2599_v0, %v1588_v53 }
0x103f   : > { %v1746_v32 = vsel %vm489_vm2, %v1742_v41, 0.0 }
0x1040   : > { %1747 = vadd.xlane.f32.xlu1 %v1746_v32 }
0x1051   : > { %1434 = vrot.lane.b32.xlu1 %v2759_v31, %s2523_s19 }
0x1054   : > { %1432 = vrot.lane.b32.xlu0 %v2754_v26, %s2523_s19 }
0x1055   : > { %1440 = vrot.lane.b32.xlu1 %v2800_v28, %s2524_s21 }
0x10cb   : > { %v1745_v42 = vpop.xlane.xlu0 %1744 }
0x10cc   : > { %v1749_v33 = vmul.f32 0.03125, %v1745_v42 }
0x10cd   : > { %v1748_v36 = vpop.xlane.xlu1 %1747 }
0x10ce   : > { %v1751_v37 = vsub.f32 %v1741_v27, %v1749_v33  ;;  %v1750_v44 = vmul.f32 0.03125, %v1748_v36 }
0x10cf   : > { %v1433_v31 = vpop.permute.xlu0 %1432 }
0x10d0   : > { %v1752_v48 = vsub.f32 %v1742_v41, %v1750_v44  ;;  %v1753_v54 = vmul.f32 %v1751_v37, %v1751_v37 }
0x10d1   : > { %v1435_v26 = vpop.permute.xlu1 %1434 }
0x10d2   : > { %v1755_v56 = vsel %vm489_vm2, %v1753_v54, 0.0  ;;  %v1754_v57 = vmul.f32 %v1752_v48, %v1752_v48 }
0x10d3   : > { %1756 = vadd.xlane.f32.xlu0 %v1755_v56 }
0x10d4   : > { %v1758_v58 = vsel %vm489_vm2, %v1754_v57, 0.0 }
0x10d5   : > { %1759 = vadd.xlane.f32.xlu1 %v1758_v58  ;;  %v1441_v28 = vpop.permute.xlu1 %1440 }
0x10e6   : > { %1448 = vrot.lane.b32.xlu1 %v2843_v25, %s2525_s22  ;;  %v1454_v25 = vsel %vm553_vm3, %v2710_v30, %v1433_v31  ;;  %v1771_v30 = vsub.s32 6, %v2662_v45 }
0x10e9   : > { %1442 = vrot.lane.b32.xlu0 %v2805_v35, %s2524_s21  ;;  %v1457_v35 = vsel %vm1456_vm5, %v1454_v25, %v1441_v28 }
0x10ed   : > { %1450 = vrot.lane.b32.xlu0 %v2847_v29, %s2525_s22  ;;  %v1455_v29 = vsel %vm553_vm3, %v2715_v34, %v1435_v26  ;;  %v1772_v34 = vrot.slane %v2620_v1, %v1771_v30  ;;  %v2434_v1 = vld [vmem:[%s3011_s6 + $0x8] sm:$0xff] (!%p2102_p5)  }
0x10ee   : > { %2306 = vmatpush3.bf16.msra.mxu0 (!%p2102_p5), %v2434_v1 }
0x1160   : > { %v1757_v59 = vpop.xlane.xlu0 %1756 }
0x1161   : > { %v1761_v61 = vmul.f32 0.03125, %v1757_v59 }
0x1162   : > { %v1760_v62 = vpop.xlane.xlu1 %1759 }
0x1163   : > { %v1763_v63 = vadd.f32 1e-12, %v1761_v61  ;;  %v1762_v2 = vmul.f32 0.03125, %v1760_v62 }
0x1164   : > { %v1443_v4 = vpop.permute.xlu0 %1442 }
0x1165   : > { %2429 = vrsqrt.f32 %v1763_v63  ;;  %v1764_v5 = vadd.f32 1e-12, %v1762_v2  ;;  %v1458_v8 = vsel %vm1456_vm5, %v1455_v29, %v1443_v4 }
0x1166   : > { %v1449_v6 = vpop.permute.xlu1 %1448 }
0x1167   : > { %2431 = vrsqrt.f32 %v1764_v5  ;;  %v1460_v7 = vsel %vm1459_vm6, %v1457_v35, %v1449_v6 }
0x1168   : > { %v1462_v9 = vsel %vm489_vm2, %v1460_v7, 0.0  ;;  %v1451_v10 = vpop.permute.xlu0 %1450 }
0x1169   : > { %1464 = vst [vmem:[%s2618_s12] sm:$0xff] %v1462_v9  ;;  %v1461_v11 = vsel %vm1459_vm6, %v1458_v8, %v1451_v10 }
0x116a   : > { %v1463_v12 = vsel %vm489_vm2, %v1461_v11, 0.0 }
0x116b   : > { %1465 = vst [vmem:[%s2618_s12 + $0x8] sm:$0xff] %v1463_v12 }
0x116f   : > { %v2430_v14 = vpop.eup %2429 }
0x1170   : > { %v1767_v50 = vmul.f32 %v2430_v14, %v1751_v37 }
0x1171   : > { %v2432_v46 = vpop.eup %2431 }
0x1172   : > { %v1773_v3 = vmul.f32 %v1772_v34, %v1767_v50  ;;  %v1768_v15 = vmul.f32 %v2432_v46, %v1752_v48  ;;  %1786 = sbr.rel (%p2102_p5) target bundleno = 4924 (0x133c), region = 90 }
0x1174   : > { %v1779_v16 = vadd.f32 %v1778_v60, %v1773_v3  ;;  %v1774_v17 = vmul.f32 %v1772_v34, %v1768_v15 }
0x1176   : > { %1781 = vst.msk [vmem:[#allocation2] sm:$0xff] %vm489_vm2, %v1779_v16  ;;  %v1780_v39 = vadd.f32 %v1778_v60, %v1774_v17 }
0x1178   : > { %1782 = vst.msk [vmem:[#allocation2 + $0x8] sm:$0xff] %vm489_vm2, %v1780_v39 }
0x117f   : > { %v1787_v52 = vld [vmem:[#allocation2] ss:$8 sm:$0x3] }
0x1180   : > { %v1792_v38 = vpack.c.bf16 %v1787_v52, %v1787_v52 }
0x1182   : > { %2308 = vmatmul.mubr.msk.bf16.vlgmr.msra.gmra.mrb[0].mxu0 %vm489_vm2, %v1792_v38 }
0x1255   : > { %v1846_v51 = vpop.f32.mrb[0].mxu0 }
0x1256   : > { %v1847_v21 = vadd.f32 %v1846_v51, %v1796_v49  ;;  %v2309_v22 = vpop.f32.mrb[1].mxu0 }
0x1257   : > { %v1849_v23 = vpop.f32.mrb[2].mxu0 }
0x1258   : > { %2437 = vtanh.f32 %v1847_v21  ;;  %v2310_v24 = vpop.f32.mrb[3].mxu0 }
0x1262   : > { %v2438_v55 = vpop.eup %2437 }
0x1263   : > { %1854 = vst.msk [vmem:[#allocation6] sm:$0x3] %vm1853_vm9, %v2438_v55  ;;  %v1859_v27 = vpack.c.bf16 %v2438_v55, %v2438_v55 }
0x1265   : > { %2316 = vmatmul.mubr.msk.bf16.vlgmr.msra.gmra.mrb[0].mxu1 %vm489_vm2, %v1859_v27 }
0x1338   : > { %v1913_v41 = vpop.f32.mrb[0].mxu1 }
0x1339   : > { %v1914_v32 = vadd.f32 %v1913_v41, %v1863_v40  ;;  %v2317_v42 = vpop.f32.mrb[1].mxu1 }
0x133a   : > { %v1916_v47 = vpop.f32.mrb[2].mxu1 }
0x133b   : > { %1919 = vst [vmem:[#allocation4] sm:$0x3] %v1914_v32  ;;  %v2318_v33 = vpop.f32.mrb[3].mxu1 }
0x133c PF: > { %p2327_p6 = scmp.eq.s32.totalorder %s2591_s14, 1  ;;  %s2528_s30 = smov [#allocation4]  }
0x133d   : > { %s1932_s11 = sshll.u32 %s2528_s30, 4  ;;  %s2529_s15 = smov [#allocation6]   ;;  %s1933_s11 = int_to_ptr.vmem [resolvable:$true] %s1932_s11 }
0x133e   : > { %s1943_s16 = sshll.u32 %s2529_s15, 4  ;;  %s2439_s18 = scalar_lea.vmem %s1933_s11, 32  ;;  %s1944_s16 = int_to_ptr.vmem [resolvable:$true] %s1943_s16 }
0x133f   : > { %p2440_p7 = scmp.ne.s32.totalorder %s1933_s11, %s2439_s18  ;;  %p2446_p10 = scmp.lt.s32.totalorder %s1933_s11, %s1933_s11 }
0x1340   : > { %p2447_p11 = scmp.lt.s32.totalorder %s2439_s18, %s2439_s18 }
0x1341   : > { %p2441_p8 = pnand %p2440_p7, %p2327_p6 }
0x1342   : > { %p2448_p12 = por %p2447_p11, %p2446_p10 }
0x1343   : > { %p2442_p9 = pneg %p2441_p8 }
0x1345   : > { %p2449_p13 = pnand %p2448_p12, %p2442_p9 }
0x1347   : > { %2452 = shalt.err (!%p2449_p13)
}
0x1348   : > { %s2453_s19 = scalar_lea.hbm %s3013_s8, 32 }
0x1349   : > { %p2454_p0 = scmp.ne.s32.totalorder %s3013_s8, %s2453_s19  ;;  %p2459_p3 = scmp.lt.u32.totalorder %s2453_s19, %s3013_s8 }
0x134b   : > { %p2455_p1 = pnand %p2454_p0, %p2327_p6 }
0x134d   : > { %p2456_p2 = pneg %p2455_p1 }
0x134f   : > { %p2461_p4 = pnand %p2459_p3, %p2456_p2 }
0x1351   : > { %2464 = shalt.err (!%p2461_p4)
}
0x1352   : > { %2320 = dma.vmem_to_hbm [thread:$0]  (%p2327_p6), %s1933_s11, 32, %s3013_s8, [#allocation5]  }
0x1353   : > { %s2465_s26 = scalar_lea.vmem %s1944_s16, 32  ;;  %p2472_p9 = scmp.lt.s32.totalorder %s1944_s16, %s1944_s16 }
0x1354   : > { %p2466_p5 = scmp.ne.s32.totalorder %s1944_s16, %s2465_s26  ;;  %p2473_p10 = scmp.lt.s32.totalorder %s2465_s26, %s2465_s26 }
0x1356   : > { %p2467_p7 = pnand %p2466_p5, %p2327_p6  ;;  %p2474_p11 = por %p2473_p10, %p2472_p9 }
0x1358   : > { %p2468_p8 = pneg %p2467_p7 }
0x135a   : > { %p2475_p12 = pnand %p2474_p11, %p2468_p8 }
0x135c   : > { %2478 = shalt.err (!%p2475_p12)
}
0x135d   : > { %s2479_s29 = scalar_lea.hbm %s3014_s9, 32 }
0x135e   : > { %p2480_p13 = scmp.ne.s32.totalorder %s3014_s9, %s2479_s29  ;;  %p2485_p2 = scmp.lt.u32.totalorder %s2479_s29, %s3014_s9 }
0x1360   : > { %p2481_p0 = pnand %p2480_p13, %p2327_p6 }
0x1362   : > { %p2482_p1 = pneg %p2481_p0 }
0x1364   : > { %p2487_p3 = pnand %p2485_p2, %p2482_p1 }
0x1366   : > { %2490 = shalt.err (!%p2487_p3)
}
0x1367   : > { %2322 = dma.vmem_to_hbm [thread:$0]  (%p2327_p6), %s1944_s16, 32, %s3014_s9, [#allocation7]  }
0x1368   : > { %2498 = dma.done.wait (%p2327_p6), [#allocation5], 32  }
0x1369   : > { %2500 = vsyncadd (%p2327_p6), [#allocation5], 4294967264 }
0x136a   : > { %2502 = dma.done.wait (%p2327_p6), [#allocation7], 32  }
0x136b   : > { %2504 = vsyncadd (%p2327_p6), [#allocation7], 4294967264 }
0x136c PF: > { %s23_s13 = sadd.s32 1, %s2507_s13  }
0x136d   : > { %p20_p4 = scmp.ge.s32.totalorder %s23_s13, 4  }
0x136f   :  { %22 = sbr.rel (!%p20_p4) target bundleno = 2 (0x2), region = 151 }
0x1376   :  { %1971 = vsyncpa [#allocation5], 1 }
0x1377   :  { %1973 = vsyncpa [#allocation5 + $0x1], 1 }
0x1378   :  { %1974 = vsyncpa [#allocation7], 1 }
0x1379   :  { %1975 = vsyncmov [#allocation3] }
0x137c   :  { %s1976_s16 = vpop.sfrf %1975 }
0x137d   :  { %p2115_p5 = scmp.ne.s32.totalorder %s1976_s16, 0 }
0x137f   :  { %1980 = shalt.err (%p2115_p5)  }

</bundles_post_ra>
